<compile_context>
chip_gen: v7x
topology: tpu7x:2x2x1
jax: 0.10.0
libtpu: 0.0.40
codegen_flags: <defaults>
</compile_context>

<pallas_src>
import functools
import math

import jax
import jax.numpy as jnp
from jax import lax
from jax.experimental import pallas as pl
from jax.experimental.pallas import tpu as pltpu

# ---------------------------------------------------------------------------
# model configuration (small, consistent with the module: d_inner = expand*d_model)
# ---------------------------------------------------------------------------
D_MODEL = 32
D_STATE = 16
D_CONV = 4
EXPAND = 2
D_INNER = EXPAND * D_MODEL                    # 64
DT_RANK = math.ceil(D_MODEL / 16)             # 2
BATCH = 2
SEQLEN = 8

# MXU operand dtype.  Keep f32 here (kernel is overhead-bound at B*L=16, so
# bf16 buys nothing measurable while loosening the correctness check); set to
# jnp.bfloat16 on v6e/v7x at production shapes (accumulation stays f32 via
# preferred_element_type; recurrence/exp/softplus stay f32 regardless).
MXU_OPERAND_DTYPE = jnp.float32

_HI = lax.Precision.HIGHEST


def _softplus(x):
    # matches torch.nn.functional.softplus (threshold=20), Mosaic-friendly
    return jnp.where(x > 20.0, x, jnp.log1p(jnp.exp(jnp.minimum(x, 20.0))))


def _silu(x):
    return x * jax.nn.sigmoid(x)


def _reverse_time(x):
    """Time-reverse axis 1 via static sublane slices (guaranteed lowering)."""
    L = x.shape[1]
    return jnp.concatenate([x[:, t:t + 1, :] for t in range(L - 1, -1, -1)],
                           axis=1)


def _mm(a, b):
    return jnp.dot(a.astype(MXU_OPERAND_DTYPE), b.astype(MXU_OPERAND_DTYPE),
                   preferred_element_type=jnp.float32)


# ---------------------------------------------------------------------------
# Fused Pallas kernel: one grid step == one stream (g or r), both directions
# lane-packed inside the step.
# ---------------------------------------------------------------------------
def _cossm_kernel(h_ref, w_in_ref, w_out_ref, conv_w_ref, conv_b_ref,
                  w_delta_ref, dt_b_ref, w_b_ref, w_c_ref, d_row_ref, a_ref,
                  out_ref,
                  *, bsz, seqlen, d_model, d_inner, d_state, d_conv, scale):
    B, L, N, D, K = bsz, seqlen, d_state, d_inner, d_conv
    D2 = 2 * D                                                   # 128 lanes

    hid = h_ref[...].astype(jnp.float32)                         # (B, L, dm)

    # ---- fused in_proj (bias=False): one lane-dense (B*L, 2D) matmul ----
    xz = _mm(hid.reshape(B * L, d_model), w_in_ref[...])         # (B*L, 2D)
    x = xz[:, :D].reshape(B, L, D)
    z = xz[:, D:].reshape(B, L, D)
    silu_z = _silu(z)    # gate is identical (in original time) for both directions

    # ---- lane-pack directions: [fwd | bwd], bwd half time-reversed once so
    #      both halves share the causal conv and the forward-in-t scan ----
    xp = jnp.concatenate([x, _reverse_time(x)], axis=-1)         # (B, L, 2D)

    # ---- depthwise causal conv, fully in-register (no VMEM scratch) ----
    cw = conv_w_ref[...]                                         # (K, 2D)
    xpad = jnp.concatenate(
        [jnp.zeros((B, K - 1, D2), jnp.float32), xp], axis=1)    # (B, L+K-1, 2D)
    u = jnp.zeros((B, L, D2), jnp.float32) + conv_b_ref[...][None]
    for k in range(K):                                           # static unroll
        u = u + cw[k:k + 1, :][None] * xpad[:, k:k + L, :]
    u = _silu(u)                                                 # (B, L, 2D)
    u2 = u.reshape(B * L, D2)

    # ---- delta: x_proj[dt] and dt_proj folded into ONE block-diag matmul ----
    delta = _softplus(_mm(u2, w_delta_ref[...]) + dt_b_ref[...]) # (B*L, 2D)
    delta = delta.reshape(B, L, D2)

    # ---- B / C projections (block-diag over directions, lane-0 aligned) ----
    bmo = _mm(u2, w_b_ref[...]).reshape(B, L, 2 * N)             # [B_fwd | B_bwd]
    cmo = _mm(u2, w_c_ref[...]).reshape(B, L, 2 * N)             # [C_fwd | C_bwd]

    # ---- scan precompute: the serial loop body is a pure VPU madd + reduce ----
    a_p = a_ref[...]                                             # (N, 2D)
    da = jnp.exp(delta[:, :, None, :] * a_p[None, None])         # (B, L, N, 2D)
    du = delta * u                                               # (B, L, 2D)
    bdu = jnp.concatenate(
        [bmo[:, :, :N, None] * du[:, :, None, :D],
         bmo[:, :, N:, None] * du[:, :, None, D:]], axis=-1)     # (B, L, N, 2D)
    cmb = jnp.concatenate(
        [jnp.broadcast_to(cmo[:, :, :N, None], (B, L, N, D)),
         jnp.broadcast_to(cmo[:, :, N:, None], (B, L, N, D))],
        axis=-1)                                                 # (B, L, N, 2D)

    # ---- selective scan (both directions at once); y kept in registers ----
    h = jnp.zeros((B, N, D2), jnp.float32)
    ys = []
    for t in range(L):                                           # static unroll
        h = da[:, t] * h + bdu[:, t]                             # (B, N, 2D)
        ys.append(jnp.sum(cmb[:, t] * h, axis=1)[:, None, :])    # (B, 1, 2D)
    y_ssm = jnp.concatenate(ys, axis=1)                          # (B, L, 2D)

    # ---- skip term, un-reverse bwd half, gate, combine, out_proj ----
    pre = y_ssm + u * d_row_ref[...][None]                       # (B, L, 2D)
    pre_rev = _reverse_time(pre)
    y_comb = (pre[:, :, :D] + pre_rev[:, :, D:]) * silu_z * scale  # (B, L, D)

    out = _mm(y_comb.reshape(B * L, D), w_out_ref[...])          # (B*L, dm)
    out_ref[...] = out.reshape(B, L, d_model).astype(out_ref.dtype)


# ---------------------------------------------------------------------------
# pallas_call plumbing
# ---------------------------------------------------------------------------
def _stream_spec(shape):
    nd = len(shape)
    return pl.BlockSpec((None,) + tuple(shape[1:]),
                        lambda s, _nd=nd: (s,) + (0,) * (_nd - 1))


def cossm_pallas(hidden_s, p, cfg, scale):
    """hidden_s: (2, B, L, d_model) stacked [g, r]; p: packed parameter dict."""
    S, B, L, d_model = hidden_s.shape
    D, N, K = cfg['d_inner'], cfg['d_state'], cfg['d_conv']
    kernel = functools.partial(
        _cossm_kernel, bsz=B, seqlen=L, d_model=d_model,
        d_inner=D, d_state=N, d_conv=K, scale=scale)

    in_specs = [
        _stream_spec(hidden_s.shape),             # hidden    (2, B, L, dm)
        _stream_spec(p['w_in_t'].shape),          # in_proj   (2, dm, 2D)
        _stream_spec(p['w_out_t'].shape),         # out_proj  (2, D, dm)
        _stream_spec(p['conv_w'].shape),          # conv W    (2, K, 2D)
        _stream_spec(p['conv_b'].shape),          # conv b    (2, 1, 2D)
        _stream_spec(p['w_delta'].shape),         # fused dt  (2, 2D, 2D)
        _stream_spec(p['dt_b'].shape),            # dt bias   (2, 1, 2D)
        _stream_spec(p['w_B'].shape),             # B proj    (2, 2D, 2N)
        _stream_spec(p['w_C'].shape),             # C proj    (2, 2D, 2N)
        _stream_spec(p['D_row'].shape),           # D skip    (2, 1, 2D)
        pl.BlockSpec(p['A_p'].shape, lambda s: (0, 0)),   # A packed (N, 2D)
    ]
    return pl.pallas_call(
        kernel,
        out_shape=jax.ShapeDtypeStruct((S, B, L, d_model), jnp.float32),
        grid=(S,),
        in_specs=in_specs,
        out_specs=pl.BlockSpec((None, B, L, d_model), lambda s: (s, 0, 0, 0)),
        compiler_params=pltpu.CompilerParams(dimension_semantics=("parallel",)),
    )(hidden_s, p['w_in_t'], p['w_out_t'], p['conv_w'], p['conv_b'],
      p['w_delta'], p['dt_b'], p['w_B'], p['w_C'], p['D_row'], p['A_p'])


def pack_params(params):
    """Lane-pack fwd/bwd parameters and stack the two streams for the kernel."""
    cfg = params['config']
    D, N, R = cfg['d_inner'], cfg['d_state'], cfg['dt_rank']

    def block_diag(f, b):                      # (D, M), (D, M) -> (2D, 2M)
        z = jnp.zeros_like(f)
        return jnp.concatenate(
            [jnp.concatenate([f, z], axis=1),
             jnp.concatenate([z, b], axis=1)], axis=0)

    def pack_stream(sp):
        f, b = sp['fwd'], sp['bwd']
        # fold dt_proj into x_proj's dt columns: u @ (Wxp_dt @ Wdt) + dt_bias
        wdt_f = jnp.dot(f['wxp_t'][:, :R], f['dtw_t'], precision=_HI)  # (D, D)
        wdt_b = jnp.dot(b['wxp_t'][:, :R], b['dtw_t'], precision=_HI)
        return dict(
            w_in_t=sp['w_in_t'],                                       # (dm, 2D)
            w_out_t=sp['w_out_t'],                                     # (D, dm)
            conv_w=jnp.concatenate([f['conv_w_t'], b['conv_w_t']], axis=-1),
            conv_b=jnp.concatenate([f['conv_b'], b['conv_b']], axis=-1),
            w_delta=block_diag(wdt_f, wdt_b),                          # (2D, 2D)
            dt_b=jnp.concatenate([f['dt_b'], b['dt_b']], axis=-1),     # (1, 2D)
            w_B=block_diag(f['wxp_t'][:, R:R + N],
                           b['wxp_t'][:, R:R + N]),                    # (2D, 2N)
            w_C=block_diag(f['wxp_t'][:, R + N:R + 2 * N],
                           b['wxp_t'][:, R + N:R + 2 * N]),            # (2D, 2N)
            D_row=jnp.concatenate([f['D_row'], b['D_row']], axis=-1),  # (1, 2D)
        )

    gp, rp = pack_stream(params['g']), pack_stream(params['r'])
    packed = {k: jnp.stack([gp[k], rp[k]]) for k in gp}
    packed['A_p'] = jnp.concatenate([params['A_t'], params['A_b_t']], axis=-1)
    return packed


def cossm_forward(params, g_hidden, r_hidden, *, if_devide_out=True):
    """Equivalent of CoSSM.forward (use_fast_path branch, inference_params=None)."""
    cfg = params['config']
    scale = 0.5 if if_devide_out else 1.0
    packed = pack_params(params)
    hidden = jnp.stack([g_hidden, r_hidden])                # (2, B, L, dm)
    out = cossm_pallas(hidden, packed, cfg, scale)          # (2, B, L, dm)
    return out[0], out[1]


# ---------------------------------------------------------------------------
# Deterministic parameter initialisation (mirrors shapes in CoSSM.__init__)
# ---------------------------------------------------------------------------
def init_params(key, d_model=D_MODEL, d_state=D_STATE, d_conv=D_CONV,
                expand=EXPAND, dt_min=0.001, dt_max=0.1, dt_init_floor=1e-4):
    d_inner = expand * d_model
    dt_rank = math.ceil(d_model / 16)
    keys = iter(jax.random.split(key, 64))

    def lin_w(shape, fan_in):
        bound = 1.0 / math.sqrt(fan_in)
        return jax.random.uniform(next(keys), shape, jnp.float32, -bound, bound)

    def branch():
        conv_w = lin_w((d_inner, d_conv), d_conv)          # (d, 1, w) with the 1 squeezed
        conv_b = lin_w((d_inner,), d_conv)
        xproj_w = lin_w((dt_rank + 2 * d_state, d_inner), d_inner)
        dt_std = dt_rank ** -0.5
        dt_w = jax.random.uniform(next(keys), (d_inner, dt_rank), jnp.float32,
                                  -dt_std, dt_std)
        dt = jnp.exp(jax.random.uniform(next(keys), (d_inner,), jnp.float32)
                     * (math.log(dt_max) - math.log(dt_min)) + math.log(dt_min))
        dt = jnp.maximum(dt, dt_init_floor)
        inv_dt = dt + jnp.log(-jnp.expm1(-dt))             # softplus inverse
        return dict(
            conv_w_t=conv_w.T,                             # (d_conv, d_inner)
            conv_b=conv_b[None, :],                        # (1, d_inner)
            wxp_t=xproj_w.T,                               # (d_inner, R+2N) = [dt|B|C]
            dtw_t=dt_w.T,                                  # (dt_rank, d_inner)
            dt_b=inv_dt[None, :],                          # (1, d_inner)
            D_row=jnp.ones((1, d_inner), jnp.float32),
        )

    def stream():
        w_in = lin_w((2 * d_inner, d_model), d_model)      # in_proj weight, bias=False
        w_out = lin_w((d_model, d_inner), d_inner)         # out_proj weight, bias=False
        return dict(w_in_t=w_in.T,                         # (d_model, 2*d_inner) = [x|z]
                    w_out_t=w_out.T,                       # (d_inner, d_model)
                    fwd=branch(), bwd=branch())

    # A_log = log(arange(1..d_state)) broadcast to (d_inner, d_state); A = -exp(A_log)
    A = -jnp.tile(jnp.arange(1, d_state + 1, dtype=jnp.float32)[None, :], (d_inner, 1))
    return dict(
        g=stream(), r=stream(),
        A_t=A.T, A_b_t=A.T,                                # (d_state, d_inner)
        config=dict(d_model=d_model, d_inner=d_inner, d_state=d_state,
                    d_conv=d_conv, dt_rank=dt_rank),
    )


# ---------------------------------------------------------------------------
# Pure-JAX reference (selective_scan_ref semantics, explicit flips) for validation
# ---------------------------------------------------------------------------
def _ref_mamba_inner(hidden, w_in_t, br, a_t, cfg):
    d_inner, d_state, d_conv, dt_rank = (cfg['d_inner'], cfg['d_state'],
                                         cfg['d_conv'], cfg['dt_rank'])
    bsz, L, _ = hidden.shape
    A = a_t.T                                              # (d_inner, d_state)
    xz = jnp.dot(hidden, w_in_t, precision=_HI)
    x, z = xz[..., :d_inner], xz[..., d_inner:]
    xpad = jnp.pad(x, ((0, 0), (d_conv - 1, 0), (0, 0)))
    u = jnp.zeros_like(x) + br['conv_b']
    for k in range(d_conv):
        u = u + xpad[:, k:k + L, :] * br['conv_w_t'][k]
    u = _silu(u)
    xdbc = jnp.dot(u, br['wxp_t'], precision=_HI)
    dt_in = xdbc[..., :dt_rank]
    bm = xdbc[..., dt_rank:dt_rank + d_state]
    cm = xdbc[..., dt_rank + d_state:]
    delta = _softplus(jnp.dot(dt_in, br['dtw_t'], precision=_HI) + br['dt_b'])
    h = jnp.zeros((bsz, d_inner, d_state), jnp.float32)
    ys = []
    for t in range(L):
        da = jnp.exp(delta[:, t, :, None] * A[None])
        dbu = delta[:, t, :, None] * u[:, t, :, None] * bm[:, t, None, :]
        h = da * h + dbu
        ys.append(jnp.einsum('bdn,bn->bd', h, cm[:, t], precision=_HI))
    y = jnp.stack(ys, axis=1) + u * br['D_row']
    return y * _silu(z)


def ref_forward(params, g_hidden, r_hidden, *, if_devide_out=True):
    cfg = params['config']
    scale = 0.5 if if_devide_out else 1.0
    outs = []
    for name, hidden in (('g', g_hidden), ('r', r_hidden)):
        sp = params[name]
        yf = _ref_mamba_inner(hidden, sp['w_in_t'], sp['fwd'], params['A_t'], cfg)
        yb = _ref_mamba_inner(hidden[:, ::-1, :], sp['w_in_t'], sp['bwd'],
                              params['A_b_t'], cfg)
        yb = yb[:, ::-1, :]
        outs.append(jnp.dot(scale * yf + scale * yb, sp['w_out_t'], precision=_HI))
    return tuple(outs)


# ---------------------------------------------------------------------------
if __name__ == "__main__":
    key = jax.random.PRNGKey(0)
    kp, kg, kr = jax.random.split(key, 3)
    params = init_params(kp)

    g_hidden = jax.random.normal(kg, (BATCH, SEQLEN, D_MODEL), jnp.float32)
    r_hidden = jax.random.normal(kr, (BATCH, SEQLEN, D_MODEL), jnp.float32)

    g_out, r_out = cossm_forward(params, g_hidden, r_hidden)
    jax.block_until_ready((g_out, r_out))
    assert g_out.shape == (BATCH, SEQLEN, D_MODEL)
    assert r_out.shape == (BATCH, SEQLEN, D_MODEL)

    g_ref, r_ref = ref_forward(params, g_hidden, r_hidden)
    err = max(float(jnp.max(jnp.abs(g_out - g_ref))),
              float(jnp.max(jnp.abs(r_out - r_ref))))
    # f32 activations/state everywhere; small headroom for MXU pass precision.
    tol = 5e-3 if MXU_OPERAND_DTYPE == jnp.float32 else 5e-2
    assert err < tol, f"kernel/reference mismatch, max abs err = {err}"

    print("KERNEL_OK")
</pallas_src>

<mosaic_0001>
module attributes {stable_mosaic.version = 11 : i64} {
  func.func @_cossm_kernel(%arg0: i32, %arg1: memref<1x2x8x32xf32, #tpu.memory_space<vmem>>, %arg2: memref<1x32x128xf32, #tpu.memory_space<vmem>>, %arg3: memref<1x64x32xf32, #tpu.memory_space<vmem>>, %arg4: memref<1x4x128xf32, #tpu.memory_space<vmem>>, %arg5: memref<1x1x128xf32, #tpu.memory_space<vmem>>, %arg6: memref<1x128x128xf32, #tpu.memory_space<vmem>>, %arg7: memref<1x1x128xf32, #tpu.memory_space<vmem>>, %arg8: memref<1x128x32xf32, #tpu.memory_space<vmem>>, %arg9: memref<1x128x32xf32, #tpu.memory_space<vmem>>, %arg10: memref<1x1x128xf32, #tpu.memory_space<vmem>>, %arg11: memref<16x128xf32, #tpu.memory_space<vmem>>, %arg12: memref<1x2x8x32xf32, #tpu.memory_space<vmem>>) attributes {dimension_semantics = [#tpu.dimension_semantics<parallel>], iteration_bounds = array<i64: 2>, scalar_prefetch = 0 : i64, scratch_operands = 0 : i64, tpu.core_type = #tpu.core_type<tc>, window_params = [{transform_indices = @transform_0, window_bounds = array<i64: 1, 2, 8, 32>}, {transform_indices = @transform_1, window_bounds = array<i64: 1, 32, 128>}, {transform_indices = @transform_2, window_bounds = array<i64: 1, 64, 32>}, {transform_indices = @transform_3, window_bounds = array<i64: 1, 4, 128>}, {transform_indices = @transform_4, window_bounds = array<i64: 1, 1, 128>}, {transform_indices = @transform_5, window_bounds = array<i64: 1, 128, 128>}, {transform_indices = @transform_6, window_bounds = array<i64: 1, 1, 128>}, {transform_indices = @transform_7, window_bounds = array<i64: 1, 128, 32>}, {transform_indices = @transform_8, window_bounds = array<i64: 1, 128, 32>}, {transform_indices = @transform_9, window_bounds = array<i64: 1, 1, 128>}, {pipeline_mode = #tpu.pipeline_mode<synchronous>, transform_indices = @transform_10, window_bounds = array<i64: 16, 128>}, {transform_indices = @transform_11, window_bounds = array<i64: 1, 2, 8, 32>}]} {
    %c0 = arith.constant 0 : index
    %c0_0 = arith.constant 0 : index
    %c0_1 = arith.constant 0 : index
    %c0_2 = arith.constant 0 : index
    %0 = vector.load %arg1[%c0, %c0_0, %c0_1, %c0_2] : memref<1x2x8x32xf32, #tpu.memory_space<vmem>>, vector<1x2x8x32xf32>
    %1 = vector.shape_cast %0 : vector<1x2x8x32xf32> to vector<2x8x32xf32>
    %2 = vector.shape_cast %1 : vector<2x8x32xf32> to vector<16x32xf32>
    %c0_3 = arith.constant 0 : index
    %c0_4 = arith.constant 0 : index
    %c0_5 = arith.constant 0 : index
    %3 = vector.load %arg2[%c0_3, %c0_4, %c0_5] : memref<1x32x128xf32, #tpu.memory_space<vmem>>, vector<1x32x128xf32>
    %4 = vector.shape_cast %3 : vector<1x32x128xf32> to vector<32x128xf32>
    %cst = arith.constant dense<0.000000e+00> : vector<16x128xf32>
    %5 = tpu.matmul %2, %4, %cst {dimension_numbers = #tpu.dot_dimension_numbers<[1], [0], [0], [1], [0, 0, 1, 1], [], []>} : vector<16x32xf32>, vector<32x128xf32>, vector<16x128xf32> -> vector<16x128xf32>
    %6 = vector.extract_strided_slice %5 {offsets = [0, 0], sizes = [16, 64], strides = [1, 1]} : vector<16x128xf32> to vector<16x64xf32>
    %7 = vector.shape_cast %6 : vector<16x64xf32> to vector<2x8x64xf32>
    %8 = vector.extract_strided_slice %5 {offsets = [0, 64], sizes = [16, 64], strides = [1, 1]} : vector<16x128xf32> to vector<16x64xf32>
    %9 = vector.shape_cast %8 : vector<16x64xf32> to vector<2x8x64xf32>
    %10 = arith.negf %9 : vector<2x8x64xf32>
    %11 = math.exp %10 : vector<2x8x64xf32>
    %cst_6 = arith.constant 1.000000e+00 : f32
    %12 = vector.broadcast %cst_6 : f32 to vector<2x8x64xf32>
    %13 = arith.addf %12, %11 : vector<2x8x64xf32>
    %14 = arith.divf %12, %13 : vector<2x8x64xf32>
    %15 = arith.mulf %9, %14 : vector<2x8x64xf32>
    %16 = vector.extract_strided_slice %7 {offsets = [0, 7, 0], sizes = [2, 1, 64], strides = [1, 1, 1]} : vector<2x8x64xf32> to vector<2x1x64xf32>
    %17 = vector.extract_strided_slice %7 {offsets = [0, 6, 0], sizes = [2, 1, 64], strides = [1, 1, 1]} : vector<2x8x64xf32> to vector<2x1x64xf32>
    %18 = vector.extract_strided_slice %7 {offsets = [0, 5, 0], sizes = [2, 1, 64], strides = [1, 1, 1]} : vector<2x8x64xf32> to vector<2x1x64xf32>
    %19 = vector.extract_strided_slice %7 {offsets = [0, 4, 0], sizes = [2, 1, 64], strides = [1, 1, 1]} : vector<2x8x64xf32> to vector<2x1x64xf32>
    %20 = vector.extract_strided_slice %7 {offsets = [0, 3, 0], sizes = [2, 1, 64], strides = [1, 1, 1]} : vector<2x8x64xf32> to vector<2x1x64xf32>
    %21 = vector.extract_strided_slice %7 {offsets = [0, 2, 0], sizes = [2, 1, 64], strides = [1, 1, 1]} : vector<2x8x64xf32> to vector<2x1x64xf32>
    %22 = vector.extract_strided_slice %7 {offsets = [0, 1, 0], sizes = [2, 1, 64], strides = [1, 1, 1]} : vector<2x8x64xf32> to vector<2x1x64xf32>
    %23 = vector.extract_strided_slice %7 {offsets = [0, 0, 0], sizes = [2, 1, 64], strides = [1, 1, 1]} : vector<2x8x64xf32> to vector<2x1x64xf32>
    %24 = tpu.concatenate %16, %17, %18, %19, %20, %21, %22, %23 in 1 : vector<2x1x64xf32>, vector<2x1x64xf32>, vector<2x1x64xf32>, vector<2x1x64xf32>, vector<2x1x64xf32>, vector<2x1x64xf32>, vector<2x1x64xf32>, vector<2x1x64xf32> -> vector<2x8x64xf32>
    %25 = tpu.concatenate %7, %24 in 2 : vector<2x8x64xf32>, vector<2x8x64xf32> -> vector<2x8x128xf32>
    %c0_7 = arith.constant 0 : index
    %c0_8 = arith.constant 0 : index
    %c0_9 = arith.constant 0 : index
    %26 = vector.load %arg4[%c0_7, %c0_8, %c0_9] : memref<1x4x128xf32, #tpu.memory_space<vmem>>, vector<1x4x128xf32>
    %27 = vector.shape_cast %26 : vector<1x4x128xf32> to vector<4x128xf32>
    %cst_10 = arith.constant 0.000000e+00 : f32
    %28 = vector.broadcast %cst_10 : f32 to vector<2x3x128xf32>
    %29 = tpu.concatenate %28, %25 in 1 : vector<2x3x128xf32>, vector<2x8x128xf32> -> vector<2x11x128xf32>
    %cst_11 = arith.constant 0.000000e+00 : f32
    %30 = vector.broadcast %cst_11 : f32 to vector<2x8x128xf32>
    %c0_12 = arith.constant 0 : index
    %c0_13 = arith.constant 0 : index
    %c0_14 = arith.constant 0 : index
    %31 = vector.load %arg5[%c0_12, %c0_13, %c0_14] : memref<1x1x128xf32, #tpu.memory_space<vmem>>, vector<1x1x128xf32>
    %32 = vector.shape_cast %31 : vector<1x1x128xf32> to vector<1x128xf32>
    %33 = vector.shape_cast %32 : vector<1x128xf32> to vector<1x1x128xf32>
    %34 = vector.broadcast %33 : vector<1x1x128xf32> to vector<2x8x128xf32>
    %35 = arith.addf %30, %34 : vector<2x8x128xf32>
    %36 = vector.extract_strided_slice %27 {offsets = [0, 0], sizes = [1, 128], strides = [1, 1]} : vector<4x128xf32> to vector<1x128xf32>
    %37 = vector.shape_cast %36 : vector<1x128xf32> to vector<1x1x128xf32>
    %38 = vector.extract_strided_slice %29 {offsets = [0, 0, 0], sizes = [2, 8, 128], strides = [1, 1, 1]} : vector<2x11x128xf32> to vector<2x8x128xf32>
    %39 = vector.broadcast %37 : vector<1x1x128xf32> to vector<2x8x128xf32>
    %40 = arith.mulf %39, %38 : vector<2x8x128xf32>
    %41 = arith.addf %35, %40 : vector<2x8x128xf32>
    %42 = vector.extract_strided_slice %27 {offsets = [1, 0], sizes = [1, 128], strides = [1, 1]} : vector<4x128xf32> to vector<1x128xf32>
    %43 = vector.shape_cast %42 : vector<1x128xf32> to vector<1x1x128xf32>
    %44 = vector.extract_strided_slice %29 {offsets = [0, 1, 0], sizes = [2, 8, 128], strides = [1, 1, 1]} : vector<2x11x128xf32> to vector<2x8x128xf32>
    %45 = vector.broadcast %43 : vector<1x1x128xf32> to vector<2x8x128xf32>
    %46 = arith.mulf %45, %44 : vector<2x8x128xf32>
    %47 = arith.addf %41, %46 : vector<2x8x128xf32>
    %48 = vector.extract_strided_slice %27 {offsets = [2, 0], sizes = [1, 128], strides = [1, 1]} : vector<4x128xf32> to vector<1x128xf32>
    %49 = vector.shape_cast %48 : vector<1x128xf32> to vector<1x1x128xf32>
    %50 = vector.extract_strided_slice %29 {offsets = [0, 2, 0], sizes = [2, 8, 128], strides = [1, 1, 1]} : vector<2x11x128xf32> to vector<2x8x128xf32>
    %51 = vector.broadcast %49 : vector<1x1x128xf32> to vector<2x8x128xf32>
    %52 = arith.mulf %51, %50 : vector<2x8x128xf32>
    %53 = arith.addf %47, %52 : vector<2x8x128xf32>
    %54 = vector.extract_strided_slice %27 {offsets = [3, 0], sizes = [1, 128], strides = [1, 1]} : vector<4x128xf32> to vector<1x128xf32>
    %55 = vector.shape_cast %54 : vector<1x128xf32> to vector<1x1x128xf32>
    %56 = vector.extract_strided_slice %29 {offsets = [0, 3, 0], sizes = [2, 8, 128], strides = [1, 1, 1]} : vector<2x11x128xf32> to vector<2x8x128xf32>
    %57 = vector.broadcast %55 : vector<1x1x128xf32> to vector<2x8x128xf32>
    %58 = arith.mulf %57, %56 : vector<2x8x128xf32>
    %59 = arith.addf %53, %58 : vector<2x8x128xf32>
    %60 = arith.negf %59 : vector<2x8x128xf32>
    %61 = math.exp %60 : vector<2x8x128xf32>
    %cst_15 = arith.constant 1.000000e+00 : f32
    %62 = vector.broadcast %cst_15 : f32 to vector<2x8x128xf32>
    %63 = arith.addf %62, %61 : vector<2x8x128xf32>
    %64 = arith.divf %62, %63 : vector<2x8x128xf32>
    %65 = arith.mulf %59, %64 : vector<2x8x128xf32>
    %66 = vector.shape_cast %65 : vector<2x8x128xf32> to vector<16x128xf32>
    %c0_16 = arith.constant 0 : index
    %c0_17 = arith.constant 0 : index
    %c0_18 = arith.constant 0 : index
    %67 = vector.load %arg6[%c0_16, %c0_17, %c0_18] : memref<1x128x128xf32, #tpu.memory_space<vmem>>, vector<1x128x128xf32>
    %68 = vector.shape_cast %67 : vector<1x128x128xf32> to vector<128x128xf32>
    %cst_19 = arith.constant dense<0.000000e+00> : vector<16x128xf32>
    %69 = tpu.matmul %66, %68, %cst_19 {dimension_numbers = #tpu.dot_dimension_numbers<[1], [0], [0], [1], [0, 0, 1, 1], [], []>} : vector<16x128xf32>, vector<128x128xf32>, vector<16x128xf32> -> vector<16x128xf32>
    %c0_20 = arith.constant 0 : index
    %c0_21 = arith.constant 0 : index
    %c0_22 = arith.constant 0 : index
    %70 = vector.load %arg7[%c0_20, %c0_21, %c0_22] : memref<1x1x128xf32, #tpu.memory_space<vmem>>, vector<1x1x128xf32>
    %71 = vector.shape_cast %70 : vector<1x1x128xf32> to vector<1x128xf32>
    %72 = vector.broadcast %71 : vector<1x128xf32> to vector<16x128xf32>
    %73 = arith.addf %69, %72 : vector<16x128xf32>
    %cst_23 = arith.constant 2.000000e+01 : f32
    %74 = vector.broadcast %cst_23 : f32 to vector<16x128xf32>
    %75 = arith.cmpf ogt, %73, %74 : vector<16x128xf32>
    %cst_24 = arith.constant 2.000000e+01 : f32
    %76 = vector.broadcast %cst_24 : f32 to vector<16x128xf32>
    %77 = arith.minimumf %73, %76 : vector<16x128xf32>
    %78 = math.exp %77 : vector<16x128xf32>
    %79 = math.log1p %78 : vector<16x128xf32>
    %80 = arith.select %75, %73, %79 : vector<16x128xi1>, vector<16x128xf32>
    %81 = vector.shape_cast %80 : vector<16x128xf32> to vector<2x8x128xf32>
    %c0_25 = arith.constant 0 : index
    %c0_26 = arith.constant 0 : index
    %c0_27 = arith.constant 0 : index
    %82 = vector.load %arg8[%c0_25, %c0_26, %c0_27] : memref<1x128x32xf32, #tpu.memory_space<vmem>>, vector<1x128x32xf32>
    %83 = vector.shape_cast %82 : vector<1x128x32xf32> to vector<128x32xf32>
    %cst_28 = arith.constant dense<0.000000e+00> : vector<16x32xf32>
    %84 = tpu.matmul %66, %83, %cst_28 {dimension_numbers = #tpu.dot_dimension_numbers<[1], [0], [0], [1], [0, 0, 1, 1], [], []>} : vector<16x128xf32>, vector<128x32xf32>, vector<16x32xf32> -> vector<16x32xf32>
    %85 = vector.shape_cast %84 : vector<16x32xf32> to vector<2x8x32xf32>
    %c0_29 = arith.constant 0 : index
    %c0_30 = arith.constant 0 : index
    %c0_31 = arith.constant 0 : index
    %86 = vector.load %arg9[%c0_29, %c0_30, %c0_31] : memref<1x128x32xf32, #tpu.memory_space<vmem>>, vector<1x128x32xf32>
    %87 = vector.shape_cast %86 : vector<1x128x32xf32> to vector<128x32xf32>
    %cst_32 = arith.constant dense<0.000000e+00> : vector<16x32xf32>
    %88 = tpu.matmul %66, %87, %cst_32 {dimension_numbers = #tpu.dot_dimension_numbers<[1], [0], [0], [1], [0, 0, 1, 1], [], []>} : vector<16x128xf32>, vector<128x32xf32>, vector<16x32xf32> -> vector<16x32xf32>
    %89 = vector.shape_cast %88 : vector<16x32xf32> to vector<2x8x32xf32>
    %c0_33 = arith.constant 0 : index
    %c0_34 = arith.constant 0 : index
    %90 = vector.load %arg11[%c0_33, %c0_34] : memref<16x128xf32, #tpu.memory_space<vmem>>, vector<16x128xf32>
    %91 = vector.shape_cast %81 : vector<2x8x128xf32> to vector<2x8x1x128xf32>
    %92 = vector.shape_cast %90 : vector<16x128xf32> to vector<1x1x16x128xf32>
    %93 = vector.broadcast %91 : vector<2x8x1x128xf32> to vector<2x8x16x128xf32>
    %94 = vector.broadcast %92 : vector<1x1x16x128xf32> to vector<2x8x16x128xf32>
    %95 = arith.mulf %93, %94 : vector<2x8x16x128xf32>
    %96 = math.exp %95 : vector<2x8x16x128xf32>
    %97 = arith.mulf %81, %65 : vector<2x8x128xf32>
    %98 = vector.extract_strided_slice %85 {offsets = [0, 0, 0], sizes = [2, 8, 16], strides = [1, 1, 1]} : vector<2x8x32xf32> to vector<2x8x16xf32>
    %99 = vector.shape_cast %98 : vector<2x8x16xf32> to vector<2x8x16x1xf32>
    %100 = vector.extract_strided_slice %97 {offsets = [0, 0, 0], sizes = [2, 8, 64], strides = [1, 1, 1]} : vector<2x8x128xf32> to vector<2x8x64xf32>
    %101 = vector.shape_cast %100 : vector<2x8x64xf32> to vector<2x8x1x64xf32>
    %102 = vector.broadcast %99 : vector<2x8x16x1xf32> to vector<2x8x16x64xf32>
    %103 = vector.broadcast %101 : vector<2x8x1x64xf32> to vector<2x8x16x64xf32>
    %104 = arith.mulf %102, %103 : vector<2x8x16x64xf32>
    %105 = vector.extract_strided_slice %85 {offsets = [0, 0, 16], sizes = [2, 8, 16], strides = [1, 1, 1]} : vector<2x8x32xf32> to vector<2x8x16xf32>
    %106 = vector.shape_cast %105 : vector<2x8x16xf32> to vector<2x8x16x1xf32>
    %107 = vector.extract_strided_slice %97 {offsets = [0, 0, 64], sizes = [2, 8, 64], strides = [1, 1, 1]} : vector<2x8x128xf32> to vector<2x8x64xf32>
    %108 = vector.shape_cast %107 : vector<2x8x64xf32> to vector<2x8x1x64xf32>
    %109 = vector.broadcast %106 : vector<2x8x16x1xf32> to vector<2x8x16x64xf32>
    %110 = vector.broadcast %108 : vector<2x8x1x64xf32> to vector<2x8x16x64xf32>
    %111 = arith.mulf %109, %110 : vector<2x8x16x64xf32>
    %112 = tpu.concatenate %104, %111 in 3 : vector<2x8x16x64xf32>, vector<2x8x16x64xf32> -> vector<2x8x16x128xf32>
    %113 = vector.extract_strided_slice %89 {offsets = [0, 0, 0], sizes = [2, 8, 16], strides = [1, 1, 1]} : vector<2x8x32xf32> to vector<2x8x16xf32>
    %114 = vector.shape_cast %113 : vector<2x8x16xf32> to vector<2x8x16x1xf32>
    %115 = vector.shape_cast %114 : vector<2x8x16x1xf32> to vector<2x8x16x1xf32>
    %116 = vector.broadcast %115 : vector<2x8x16x1xf32> to vector<2x8x16x64xf32>
    %117 = vector.extract_strided_slice %89 {offsets = [0, 0, 16], sizes = [2, 8, 16], strides = [1, 1, 1]} : vector<2x8x32xf32> to vector<2x8x16xf32>
    %118 = vector.shape_cast %117 : vector<2x8x16xf32> to vector<2x8x16x1xf32>
    %119 = vector.shape_cast %118 : vector<2x8x16x1xf32> to vector<2x8x16x1xf32>
    %120 = vector.broadcast %119 : vector<2x8x16x1xf32> to vector<2x8x16x64xf32>
    %121 = tpu.concatenate %116, %120 in 3 : vector<2x8x16x64xf32>, vector<2x8x16x64xf32> -> vector<2x8x16x128xf32>
    %cst_35 = arith.constant 0.000000e+00 : f32
    %122 = vector.broadcast %cst_35 : f32 to vector<2x16x128xf32>
    %123 = vector.extract_strided_slice %96 {offsets = [0, 0, 0, 0], sizes = [2, 1, 16, 128], strides = [1, 1, 1, 1]} : vector<2x8x16x128xf32> to vector<2x1x16x128xf32>
    %124 = vector.shape_cast %123 : vector<2x1x16x128xf32> to vector<2x16x128xf32>
    %125 = arith.mulf %124, %122 : vector<2x16x128xf32>
    %126 = vector.extract_strided_slice %112 {offsets = [0, 0, 0, 0], sizes = [2, 1, 16, 128], strides = [1, 1, 1, 1]} : vector<2x8x16x128xf32> to vector<2x1x16x128xf32>
    %127 = vector.shape_cast %126 : vector<2x1x16x128xf32> to vector<2x16x128xf32>
    %128 = arith.addf %125, %127 : vector<2x16x128xf32>
    %129 = vector.extract_strided_slice %121 {offsets = [0, 0, 0, 0], sizes = [2, 1, 16, 128], strides = [1, 1, 1, 1]} : vector<2x8x16x128xf32> to vector<2x1x16x128xf32>
    %130 = vector.shape_cast %129 : vector<2x1x16x128xf32> to vector<2x16x128xf32>
    %131 = arith.mulf %130, %128 : vector<2x16x128xf32>
    %cst_36 = arith.constant dense<0.000000e+00> : vector<2x128xf32>
    %132 = vector.multi_reduction <add>, %131, %cst_36 [1] : vector<2x16x128xf32> to vector<2x128xf32>
    %133 = vector.shape_cast %132 : vector<2x128xf32> to vector<2x1x128xf32>
    %134 = vector.extract_strided_slice %96 {offsets = [0, 1, 0, 0], sizes = [2, 1, 16, 128], strides = [1, 1, 1, 1]} : vector<2x8x16x128xf32> to vector<2x1x16x128xf32>
    %135 = vector.shape_cast %134 : vector<2x1x16x128xf32> to vector<2x16x128xf32>
    %136 = arith.mulf %135, %128 : vector<2x16x128xf32>
    %137 = vector.extract_strided_slice %112 {offsets = [0, 1, 0, 0], sizes = [2, 1, 16, 128], strides = [1, 1, 1, 1]} : vector<2x8x16x128xf32> to vector<2x1x16x128xf32>
    %138 = vector.shape_cast %137 : vector<2x1x16x128xf32> to vector<2x16x128xf32>
    %139 = arith.addf %136, %138 : vector<2x16x128xf32>
    %140 = vector.extract_strided_slice %121 {offsets = [0, 1, 0, 0], sizes = [2, 1, 16, 128], strides = [1, 1, 1, 1]} : vector<2x8x16x128xf32> to vector<2x1x16x128xf32>
    %141 = vector.shape_cast %140 : vector<2x1x16x128xf32> to vector<2x16x128xf32>
    %142 = arith.mulf %141, %139 : vector<2x16x128xf32>
    %cst_37 = arith.constant dense<0.000000e+00> : vector<2x128xf32>
    %143 = vector.multi_reduction <add>, %142, %cst_37 [1] : vector<2x16x128xf32> to vector<2x128xf32>
    %144 = vector.shape_cast %143 : vector<2x128xf32> to vector<2x1x128xf32>
    %145 = vector.extract_strided_slice %96 {offsets = [0, 2, 0, 0], sizes = [2, 1, 16, 128], strides = [1, 1, 1, 1]} : vector<2x8x16x128xf32> to vector<2x1x16x128xf32>
    %146 = vector.shape_cast %145 : vector<2x1x16x128xf32> to vector<2x16x128xf32>
    %147 = arith.mulf %146, %139 : vector<2x16x128xf32>
    %148 = vector.extract_strided_slice %112 {offsets = [0, 2, 0, 0], sizes = [2, 1, 16, 128], strides = [1, 1, 1, 1]} : vector<2x8x16x128xf32> to vector<2x1x16x128xf32>
    %149 = vector.shape_cast %148 : vector<2x1x16x128xf32> to vector<2x16x128xf32>
    %150 = arith.addf %147, %149 : vector<2x16x128xf32>
    %151 = vector.extract_strided_slice %121 {offsets = [0, 2, 0, 0], sizes = [2, 1, 16, 128], strides = [1, 1, 1, 1]} : vector<2x8x16x128xf32> to vector<2x1x16x128xf32>
    %152 = vector.shape_cast %151 : vector<2x1x16x128xf32> to vector<2x16x128xf32>
    %153 = arith.mulf %152, %150 : vector<2x16x128xf32>
    %cst_38 = arith.constant dense<0.000000e+00> : vector<2x128xf32>
    %154 = vector.multi_reduction <add>, %153, %cst_38 [1] : vector<2x16x128xf32> to vector<2x128xf32>
    %155 = vector.shape_cast %154 : vector<2x128xf32> to vector<2x1x128xf32>
    %156 = vector.extract_strided_slice %96 {offsets = [0, 3, 0, 0], sizes = [2, 1, 16, 128], strides = [1, 1, 1, 1]} : vector<2x8x16x128xf32> to vector<2x1x16x128xf32>
    %157 = vector.shape_cast %156 : vector<2x1x16x128xf32> to vector<2x16x128xf32>
    %158 = arith.mulf %157, %150 : vector<2x16x128xf32>
    %159 = vector.extract_strided_slice %112 {offsets = [0, 3, 0, 0], sizes = [2, 1, 16, 128], strides = [1, 1, 1, 1]} : vector<2x8x16x128xf32> to vector<2x1x16x128xf32>
    %160 = vector.shape_cast %159 : vector<2x1x16x128xf32> to vector<2x16x128xf32>
    %161 = arith.addf %158, %160 : vector<2x16x128xf32>
    %162 = vector.extract_strided_slice %121 {offsets = [0, 3, 0, 0], sizes = [2, 1, 16, 128], strides = [1, 1, 1, 1]} : vector<2x8x16x128xf32> to vector<2x1x16x128xf32>
    %163 = vector.shape_cast %162 : vector<2x1x16x128xf32> to vector<2x16x128xf32>
    %164 = arith.mulf %163, %161 : vector<2x16x128xf32>
    %cst_39 = arith.constant dense<0.000000e+00> : vector<2x128xf32>
    %165 = vector.multi_reduction <add>, %164, %cst_39 [1] : vector<2x16x128xf32> to vector<2x128xf32>
    %166 = vector.shape_cast %165 : vector<2x128xf32> to vector<2x1x128xf32>
    %167 = vector.extract_strided_slice %96 {offsets = [0, 4, 0, 0], sizes = [2, 1, 16, 128], strides = [1, 1, 1, 1]} : vector<2x8x16x128xf32> to vector<2x1x16x128xf32>
    %168 = vector.shape_cast %167 : vector<2x1x16x128xf32> to vector<2x16x128xf32>
    %169 = arith.mulf %168, %161 : vector<2x16x128xf32>
    %170 = vector.extract_strided_slice %112 {offsets = [0, 4, 0, 0], sizes = [2, 1, 16, 128], strides = [1, 1, 1, 1]} : vector<2x8x16x128xf32> to vector<2x1x16x128xf32>
    %171 = vector.shape_cast %170 : vector<2x1x16x128xf32> to vector<2x16x128xf32>
    %172 = arith.addf %169, %171 : vector<2x16x128xf32>
    %173 = vector.extract_strided_slice %121 {offsets = [0, 4, 0, 0], sizes = [2, 1, 16, 128], strides = [1, 1, 1, 1]} : vector<2x8x16x128xf32> to vector<2x1x16x128xf32>
    %174 = vector.shape_cast %173 : vector<2x1x16x128xf32> to vector<2x16x128xf32>
    %175 = arith.mulf %174, %172 : vector<2x16x128xf32>
    %cst_40 = arith.constant dense<0.000000e+00> : vector<2x128xf32>
    %176 = vector.multi_reduction <add>, %175, %cst_40 [1] : vector<2x16x128xf32> to vector<2x128xf32>
    %177 = vector.shape_cast %176 : vector<2x128xf32> to vector<2x1x128xf32>
    %178 = vector.extract_strided_slice %96 {offsets = [0, 5, 0, 0], sizes = [2, 1, 16, 128], strides = [1, 1, 1, 1]} : vector<2x8x16x128xf32> to vector<2x1x16x128xf32>
    %179 = vector.shape_cast %178 : vector<2x1x16x128xf32> to vector<2x16x128xf32>
    %180 = arith.mulf %179, %172 : vector<2x16x128xf32>
    %181 = vector.extract_strided_slice %112 {offsets = [0, 5, 0, 0], sizes = [2, 1, 16, 128], strides = [1, 1, 1, 1]} : vector<2x8x16x128xf32> to vector<2x1x16x128xf32>
    %182 = vector.shape_cast %181 : vector<2x1x16x128xf32> to vector<2x16x128xf32>
    %183 = arith.addf %180, %182 : vector<2x16x128xf32>
    %184 = vector.extract_strided_slice %121 {offsets = [0, 5, 0, 0], sizes = [2, 1, 16, 128], strides = [1, 1, 1, 1]} : vector<2x8x16x128xf32> to vector<2x1x16x128xf32>
    %185 = vector.shape_cast %184 : vector<2x1x16x128xf32> to vector<2x16x128xf32>
    %186 = arith.mulf %185, %183 : vector<2x16x128xf32>
    %cst_41 = arith.constant dense<0.000000e+00> : vector<2x128xf32>
    %187 = vector.multi_reduction <add>, %186, %cst_41 [1] : vector<2x16x128xf32> to vector<2x128xf32>
    %188 = vector.shape_cast %187 : vector<2x128xf32> to vector<2x1x128xf32>
    %189 = vector.extract_strided_slice %96 {offsets = [0, 6, 0, 0], sizes = [2, 1, 16, 128], strides = [1, 1, 1, 1]} : vector<2x8x16x128xf32> to vector<2x1x16x128xf32>
    %190 = vector.shape_cast %189 : vector<2x1x16x128xf32> to vector<2x16x128xf32>
    %191 = arith.mulf %190, %183 : vector<2x16x128xf32>
    %192 = vector.extract_strided_slice %112 {offsets = [0, 6, 0, 0], sizes = [2, 1, 16, 128], strides = [1, 1, 1, 1]} : vector<2x8x16x128xf32> to vector<2x1x16x128xf32>
    %193 = vector.shape_cast %192 : vector<2x1x16x128xf32> to vector<2x16x128xf32>
    %194 = arith.addf %191, %193 : vector<2x16x128xf32>
    %195 = vector.extract_strided_slice %121 {offsets = [0, 6, 0, 0], sizes = [2, 1, 16, 128], strides = [1, 1, 1, 1]} : vector<2x8x16x128xf32> to vector<2x1x16x128xf32>
    %196 = vector.shape_cast %195 : vector<2x1x16x128xf32> to vector<2x16x128xf32>
    %197 = arith.mulf %196, %194 : vector<2x16x128xf32>
    %cst_42 = arith.constant dense<0.000000e+00> : vector<2x128xf32>
    %198 = vector.multi_reduction <add>, %197, %cst_42 [1] : vector<2x16x128xf32> to vector<2x128xf32>
    %199 = vector.shape_cast %198 : vector<2x128xf32> to vector<2x1x128xf32>
    %200 = vector.extract_strided_slice %96 {offsets = [0, 7, 0, 0], sizes = [2, 1, 16, 128], strides = [1, 1, 1, 1]} : vector<2x8x16x128xf32> to vector<2x1x16x128xf32>
    %201 = vector.shape_cast %200 : vector<2x1x16x128xf32> to vector<2x16x128xf32>
    %202 = arith.mulf %201, %194 : vector<2x16x128xf32>
    %203 = vector.extract_strided_slice %112 {offsets = [0, 7, 0, 0], sizes = [2, 1, 16, 128], strides = [1, 1, 1, 1]} : vector<2x8x16x128xf32> to vector<2x1x16x128xf32>
    %204 = vector.shape_cast %203 : vector<2x1x16x128xf32> to vector<2x16x128xf32>
    %205 = arith.addf %202, %204 : vector<2x16x128xf32>
    %206 = vector.extract_strided_slice %121 {offsets = [0, 7, 0, 0], sizes = [2, 1, 16, 128], strides = [1, 1, 1, 1]} : vector<2x8x16x128xf32> to vector<2x1x16x128xf32>
    %207 = vector.shape_cast %206 : vector<2x1x16x128xf32> to vector<2x16x128xf32>
    %208 = arith.mulf %207, %205 : vector<2x16x128xf32>
    %cst_43 = arith.constant dense<0.000000e+00> : vector<2x128xf32>
    %209 = vector.multi_reduction <add>, %208, %cst_43 [1] : vector<2x16x128xf32> to vector<2x128xf32>
    %210 = vector.shape_cast %209 : vector<2x128xf32> to vector<2x1x128xf32>
    %211 = tpu.concatenate %133, %144, %155, %166, %177, %188, %199, %210 in 1 : vector<2x1x128xf32>, vector<2x1x128xf32>, vector<2x1x128xf32>, vector<2x1x128xf32>, vector<2x1x128xf32>, vector<2x1x128xf32>, vector<2x1x128xf32>, vector<2x1x128xf32> -> vector<2x8x128xf32>
    %c0_44 = arith.constant 0 : index
    %c0_45 = arith.constant 0 : index
    %c0_46 = arith.constant 0 : index
    %212 = vector.load %arg10[%c0_44, %c0_45, %c0_46] : memref<1x1x128xf32, #tpu.memory_space<vmem>>, vector<1x1x128xf32>
    %213 = vector.shape_cast %212 : vector<1x1x128xf32> to vector<1x128xf32>
    %214 = vector.shape_cast %213 : vector<1x128xf32> to vector<1x1x128xf32>
    %215 = vector.broadcast %214 : vector<1x1x128xf32> to vector<2x8x128xf32>
    %216 = arith.mulf %65, %215 : vector<2x8x128xf32>
    %217 = arith.addf %211, %216 : vector<2x8x128xf32>
    %218 = vector.extract_strided_slice %217 {offsets = [0, 7, 0], sizes = [2, 1, 128], strides = [1, 1, 1]} : vector<2x8x128xf32> to vector<2x1x128xf32>
    %219 = vector.extract_strided_slice %217 {offsets = [0, 6, 0], sizes = [2, 1, 128], strides = [1, 1, 1]} : vector<2x8x128xf32> to vector<2x1x128xf32>
    %220 = vector.extract_strided_slice %217 {offsets = [0, 5, 0], sizes = [2, 1, 128], strides = [1, 1, 1]} : vector<2x8x128xf32> to vector<2x1x128xf32>
    %221 = vector.extract_strided_slice %217 {offsets = [0, 4, 0], sizes = [2, 1, 128], strides = [1, 1, 1]} : vector<2x8x128xf32> to vector<2x1x128xf32>
    %222 = vector.extract_strided_slice %217 {offsets = [0, 3, 0], sizes = [2, 1, 128], strides = [1, 1, 1]} : vector<2x8x128xf32> to vector<2x1x128xf32>
    %223 = vector.extract_strided_slice %217 {offsets = [0, 2, 0], sizes = [2, 1, 128], strides = [1, 1, 1]} : vector<2x8x128xf32> to vector<2x1x128xf32>
    %224 = vector.extract_strided_slice %217 {offsets = [0, 1, 0], sizes = [2, 1, 128], strides = [1, 1, 1]} : vector<2x8x128xf32> to vector<2x1x128xf32>
    %225 = vector.extract_strided_slice %217 {offsets = [0, 0, 0], sizes = [2, 1, 128], strides = [1, 1, 1]} : vector<2x8x128xf32> to vector<2x1x128xf32>
    %226 = tpu.concatenate %218, %219, %220, %221, %222, %223, %224, %225 in 1 : vector<2x1x128xf32>, vector<2x1x128xf32>, vector<2x1x128xf32>, vector<2x1x128xf32>, vector<2x1x128xf32>, vector<2x1x128xf32>, vector<2x1x128xf32>, vector<2x1x128xf32> -> vector<2x8x128xf32>
    %227 = vector.extract_strided_slice %217 {offsets = [0, 0, 0], sizes = [2, 8, 64], strides = [1, 1, 1]} : vector<2x8x128xf32> to vector<2x8x64xf32>
    %228 = vector.extract_strided_slice %226 {offsets = [0, 0, 64], sizes = [2, 8, 64], strides = [1, 1, 1]} : vector<2x8x128xf32> to vector<2x8x64xf32>
    %229 = arith.addf %227, %228 : vector<2x8x64xf32>
    %230 = arith.mulf %229, %15 : vector<2x8x64xf32>
    %cst_47 = arith.constant 5.000000e-01 : f32
    %231 = vector.broadcast %cst_47 : f32 to vector<2x8x64xf32>
    %232 = arith.mulf %230, %231 : vector<2x8x64xf32>
    %233 = vector.shape_cast %232 : vector<2x8x64xf32> to vector<16x64xf32>
    %c0_48 = arith.constant 0 : index
    %c0_49 = arith.constant 0 : index
    %c0_50 = arith.constant 0 : index
    %234 = vector.load %arg3[%c0_48, %c0_49, %c0_50] : memref<1x64x32xf32, #tpu.memory_space<vmem>>, vector<1x64x32xf32>
    %235 = vector.shape_cast %234 : vector<1x64x32xf32> to vector<64x32xf32>
    %cst_51 = arith.constant dense<0.000000e+00> : vector<16x32xf32>
    %236 = tpu.matmul %233, %235, %cst_51 {dimension_numbers = #tpu.dot_dimension_numbers<[1], [0], [0], [1], [0, 0, 1, 1], [], []>} : vector<16x64xf32>, vector<64x32xf32>, vector<16x32xf32> -> vector<16x32xf32>
    %237 = vector.shape_cast %236 : vector<16x32xf32> to vector<2x8x32xf32>
    %c0_52 = arith.constant 0 : index
    %c0_53 = arith.constant 0 : index
    %c0_54 = arith.constant 0 : index
    %c0_55 = arith.constant 0 : index
    %238 = vector.load %arg12[%c0_52, %c0_53, %c0_54, %c0_55] : memref<1x2x8x32xf32, #tpu.memory_space<vmem>>, vector<1x2x8x32xf32>
    %239 = vector.shape_cast %238 : vector<1x2x8x32xf32> to vector<2x8x32xf32>
    %240 = vector.shape_cast %237 : vector<2x8x32xf32> to vector<1x2x8x32xf32>
    tpu.vector_store %arg12[%c0_52, %c0_53, %c0_54, %c0_55], %240 {strides = array<i32>} : memref<1x2x8x32xf32, #tpu.memory_space<vmem>>, vector<1x2x8x32xf32>,
    return
  }
  func.func @transform_0(%arg0: i32) -> (i32, i32, i32, i32) {
    %c0_i32 = arith.constant 0 : i32
    %c0_i32_0 = arith.constant 0 : i32
    %c0_i32_1 = arith.constant 0 : i32
    %c0_i32_2 = arith.constant 0 : i32
    return %arg0, %c0_i32, %c0_i32_0, %c0_i32_1 : i32, i32, i32, i32
  }
  func.func @transform_1(%arg0: i32) -> (i32, i32, i32) {
    %c0_i32 = arith.constant 0 : i32
    %c0_i32_0 = arith.constant 0 : i32
    %c0_i32_1 = arith.constant 0 : i32
    return %arg0, %c0_i32, %c0_i32_0 : i32, i32, i32
  }
  func.func @transform_2(%arg0: i32) -> (i32, i32, i32) {
    %c0_i32 = arith.constant 0 : i32
    %c0_i32_0 = arith.constant 0 : i32
    %c0_i32_1 = arith.constant 0 : i32
    return %arg0, %c0_i32, %c0_i32_0 : i32, i32, i32
  }
  func.func @transform_3(%arg0: i32) -> (i32, i32, i32) {
    %c0_i32 = arith.constant 0 : i32
    %c0_i32_0 = arith.constant 0 : i32
    %c0_i32_1 = arith.constant 0 : i32
    return %arg0, %c0_i32, %c0_i32_0 : i32, i32, i32
  }
  func.func @transform_4(%arg0: i32) -> (i32, i32, i32) {
    %c0_i32 = arith.constant 0 : i32
    %c0_i32_0 = arith.constant 0 : i32
    %c0_i32_1 = arith.constant 0 : i32
    return %arg0, %c0_i32, %c0_i32_0 : i32, i32, i32
  }
  func.func @transform_5(%arg0: i32) -> (i32, i32, i32) {
    %c0_i32 = arith.constant 0 : i32
    %c0_i32_0 = arith.constant 0 : i32
    %c0_i32_1 = arith.constant 0 : i32
    return %arg0, %c0_i32, %c0_i32_0 : i32, i32, i32
  }
  func.func @transform_6(%arg0: i32) -> (i32, i32, i32) {
    %c0_i32 = arith.constant 0 : i32
    %c0_i32_0 = arith.constant 0 : i32
    %c0_i32_1 = arith.constant 0 : i32
    return %arg0, %c0_i32, %c0_i32_0 : i32, i32, i32
  }
  func.func @transform_7(%arg0: i32) -> (i32, i32, i32) {
    %c0_i32 = arith.constant 0 : i32
    %c0_i32_0 = arith.constant 0 : i32
    %c0_i32_1 = arith.constant 0 : i32
    return %arg0, %c0_i32, %c0_i32_0 : i32, i32, i32
  }
  func.func @transform_8(%arg0: i32) -> (i32, i32, i32) {
    %c0_i32 = arith.constant 0 : i32
    %c0_i32_0 = arith.constant 0 : i32
    %c0_i32_1 = arith.constant 0 : i32
    return %arg0, %c0_i32, %c0_i32_0 : i32, i32, i32
  }
  func.func @transform_9(%arg0: i32) -> (i32, i32, i32) {
    %c0_i32 = arith.constant 0 : i32
    %c0_i32_0 = arith.constant 0 : i32
    %c0_i32_1 = arith.constant 0 : i32
    return %arg0, %c0_i32, %c0_i32_0 : i32, i32, i32
  }
  func.func @transform_10(%arg0: i32) -> (i32, i32) {
    %c0_i32 = arith.constant 0 : i32
    %c0_i32_0 = arith.constant 0 : i32
    %c0_i32_1 = arith.constant 0 : i32
    return %c0_i32, %c0_i32_0 : i32, i32
  }
  func.func @transform_11(%arg0: i32) -> (i32, i32, i32, i32) {
    %c0_i32 = arith.constant 0 : i32
    %c0_i32_0 = arith.constant 0 : i32
    %c0_i32_1 = arith.constant 0 : i32
    %c0_i32_2 = arith.constant 0 : i32
    return %arg0, %c0_i32, %c0_i32_0, %c0_i32_1 : i32, i32, i32, i32
  }
}

</mosaic_0001>

<bundles_post_ra>
// kernel: tpu_custom_call.1
= control target key start
LH: loop header
LB: loop body
LE: loop exit
PB: predicated region body
PF: predicated region fallthrough
CT: control target
= control target key end

     0   :  { %16 = vsyncpa [#allocation3], 0  ;;  %s4400_s0 = inlined_call_operand.vmem [shape: f32[2,2,8,32], index: 0, kind: input, shape index: {}]   ;;  %s4401_s1 = inlined_call_operand.vmem [shape: f32[2,32,128], index: 1, kind: input, shape index: {}]   ;;  %s4402_s2 = inlined_call_operand.vmem [shape: f32[2,64,32], index: 2, kind: input, shape index: {}]   ;;  %s4403_s3 = inlined_call_operand.vmem [shape: f32[2,4,128], index: 3, kind: input, shape index: {}]   ;;  %s4404_s4 = inlined_call_operand.vmem [shape: f32[2,1,128], index: 4, kind: input, shape index: {}]   ;;  %s4405_s5 = inlined_call_operand.vmem [shape: f32[2,128,128], index: 5, kind: input, shape index: {}]   ;;  %s4406_s6 = inlined_call_operand.vmem [shape: f32[2,1,128], index: 6, kind: input, shape index: {}]   ;;  %s4407_s7 = inlined_call_operand.vmem [shape: f32[2,128,32], index: 7, kind: input, shape index: {}]   ;;  %s4408_s8 = inlined_call_operand.vmem [shape: f32[2,128,32], index: 8, kind: input, shape index: {}]   ;;  %s4409_s9 = inlined_call_operand.vmem [shape: f32[2,1,128], index: 9, kind: input, shape index: {}]   ;;  %s4410_s10 = inlined_call_operand.vmem [shape: f32[16,128], index: 10, kind: input, shape index: {}]   ;;  %s4411_s11 = inlined_call_operand.hbm [shape: f32[2,2,8,32], index: 11, kind: output, shape index: {}]  }
   0x1   :  { %18 = vsyncpa [#allocation3 + $0x1], 0  ;;  %s3486_s17 = smov 0   ;;  %s3488_s18 = smov 0  }
   0x2   :  { %s3490_s19 = smov 0   ;;  %s3492_s20 = smov 0  }
   0x3 LB: > { %s3507_s21 = sadd.s32 4294967295, %s3419_s20   ;;  %s2858_s22 = sadd.s32 4294967294, %s3419_s20   ;;  %s3419_s20 = sphi %s3492_s20, %s4469_s20   ;;  %s3415_s19 = sphi %s3490_s19, %s4468_s19   ;;  %s3411_s18 = sphi %s3488_s18, %s4467_s18   ;;  %s3407_s17 = sphi %s3486_s17, %s4466_s17  }
   0x4   : > { %s3511_s23 = sadd.s32 1, %s3419_s20   ;;  %s312_s24 = sadd.s32 1, %s3415_s19 }
   0x5   : > { %s309_s25 = ssub.s32 %s3419_s20, %s3511_s23  ;;  %p322_p0 = scmp.ne.s32.totalorder %s3415_s19, %s3411_s18 }
   0x6   : > { %p310_p1 = scmp.eq.s32.totalorder %s309_s25, 0  ;;  %p323_p2 = scmp.eq.s32.totalorder %s3507_s21, 1 }
   0x7   : > { %p328_p3 = scmp.ne.s32.totalorder %s3411_s18, %s3407_s17  ;;  %p329_p4 = scmp.eq.s32.totalorder %s2858_s22, 1 }
   0x8   : > { %s3522_s26 = scalar_select %p310_p1, %s3415_s19, %s312_s24  }
   0x9   : > { %p3524_p5 = por %p323_p2, %p322_p0  ;;  %p3528_p6 = por %p329_p4, %p328_p3 }
   0xa   : > { %p2861_p7 = scmp.ge.s32.totalorder %s3419_s20, 1  ;;  %p423_p8 = scmp.lt.s32.totalorder %s3419_s20, 3 }
   0xc   : > { %p424_p9 = pnand %p2861_p7, %p423_p8 }
   0xe   : > { %427 = sbr.rel (%p424_p9) target bundleno = 1389 (0x56d), region = 64 }
  0x15   : > { %p501_p10 = scmp.lt.s32.totalorder %s3507_s21, 1  ;;  %vm550_vm0 = vcmask 261120   ;;  %vm664_vm1 = vcmask 1040384   ;;  %vm667_vm2 = vcmask 1041408   ;;  %vm670_vm3 = vcmask 1042432   ;;  %s3421_s25 = smov 64  }
  0x16   : > { %vm673_vm4 = vcmask 1043456   ;;  %vm676_vm5 = vcmask 1044480   ;;  %vm679_vm6 = vcmask 1045504   ;;  %vm682_vm7 = vcmask 1046528  }
  0x17   : > { %s3536_s29 = scalar_select %p501_p10, %s3507_s21, 1  ;;  %vm693_vm8 = vcmask 523264  }
  0x19   : > { %s2893_s30 = sshll.u32 %s3536_s29, 5  ;;  %s2892_s12 = sshll.u32 %s3536_s29, 4 }
  0x1a   : > { %s510_s15 = scalar_lea.vmem %s4401_s1, %s2893_s30  ;;  %s505_s24 = scalar_lea.vmem %s4400_s0, %s2892_s12 }
  0x1b   : > { %v546_v0 = vld [vmem:[%s510_s15] sm:$0xff]  ;;  %v547_v1 = vld [vmem:[%s510_s15 + $0x8] sm:$0xff]  ;;  %v548_v2 = vld [vmem:[%s510_s15 + $0x10] sm:$0xff]  ;;  %s3575_s30 = sshll.u32 %s3536_s29, 7  ;;  %s522_s12 = scalar_lea.vmem %s4404_s4, %s3536_s29 }
  0x1c   : > { %v3104_v3 = vpack.c.bf16 %v547_v1, %v546_v0  ;;  %v549_v4 = vld [vmem:[%s510_s15 + $0x18] sm:$0xff]  ;;  %v544_v5 = vld [vmem:[%s505_s24] sm:$0xff]  ;;  %v545_v7 = vld [vmem:[%s505_s24 + $0x8] sm:$0xff]  ;;  %s3581_s14 = scalar_lea.vmem %s4405_s5, %s3575_s30  ;;  %s3589_s22 = scalar_lea.vmem %s4407_s7, %s3575_s30 }
  0x1d   : > { %v3108_v6 = vpack.c.bf16 %v549_v4, %v548_v2  ;;  %2977 = vmatprep.mubr.msk.f32.mxu0 %vm550_vm0, %v544_v5  ;;  %v801_v31 = vld [vmem:[%s3581_s14] sm:$0xff]  ;;  %v802_v32 = vld [vmem:[%s3581_s14 + $0x8] sm:$0xff]  ;;  %v803_v33 = vld [vmem:[%s3581_s14 + $0x10] sm:$0xff]  ;;  %s3627_s13 = scalar_lea.vmem %s4408_s8, %s3575_s30  ;;  %s530_s30 = scalar_lea.vmem %s4406_s6, %s3536_s29 }
  0x1e   : > { %3105 = vmatprep.subr.bf16.mxu0 %v3104_v3  ;;  %v3112_v35 = vpack.c.bf16 %v802_v32, %v801_v31  ;;  %v927_v36 = vld [vmem:[%s3589_s22] sm:$0xff]  ;;  %v928_v37 = vld [vmem:[%s3589_s22 + $0x8] sm:$0xff]  ;;  %v804_v38 = vld [vmem:[%s3581_s14 + $0x18] sm:$0xff] }
  0x1f   : > { %3107 = vmatpush3.bf16.msra.mxu0 %v3104_v3  ;;  %v3144_v39 = vpack.c.bf16 %v928_v37, %v927_v36  ;;  %v3116_v40 = vpack.c.bf16 %v804_v38, %v803_v33  ;;  %v929_v41 = vld [vmem:[%s3589_s22 + $0x10] sm:$0xff]  ;;  %v930_v42 = vld [vmem:[%s3589_s22 + $0x18] sm:$0xff]  ;;  %v805_v43 = vld [vmem:[%s3581_s14 + $0x20] sm:$0xff] }
  0x20   : > { %3109 = vmatprep.subr.bf16.mxu0 %v3108_v6  ;;  %3113 = vmatprep.subr.bf16.mxu1 %v3112_v35  ;;  %v3148_v44 = vpack.c.bf16 %v930_v42, %v929_v41  ;;  %v806_v45 = vld [vmem:[%s3581_s14 + $0x28] sm:$0xff]  ;;  %v931_v46 = vld [vmem:[%s3589_s22 + $0x20] sm:$0xff]  ;;  %v807_v50 = vld [vmem:[%s3581_s14 + $0x30] sm:$0xff] }
  0x21   : > { %v932_v47 = vld [vmem:[%s3589_s22 + $0x28] sm:$0xff]  ;;  %3115 = vmatpush3.bf16.msra.mxu1 %v3112_v35  ;;  %v3120_v48 = vpack.c.bf16 %v806_v45, %v805_v43  ;;  %v808_v51 = vld [vmem:[%s3581_s14 + $0x38] sm:$0xff]  ;;  %v933_v52 = vld [vmem:[%s3589_s22 + $0x30] sm:$0xff] }
  0x22   : > { %3117 = vmatprep.subr.bf16.mxu1 %v3116_v40  ;;  %v3152_v49 = vpack.c.bf16 %v932_v47, %v931_v46  ;;  %v934_v53 = vld [vmem:[%s3589_s22 + $0x38] sm:$0xff]  ;;  %v3124_v54 = vpack.c.bf16 %v808_v51, %v807_v50  ;;  %v809_v56 = vld [vmem:[%s3581_s14 + $0x40] sm:$0xff]  ;;  %v810_v57 = vld [vmem:[%s3581_s14 + $0x48] sm:$0xff] }
  0x23   : > { %3111 = vmatpush3.bf16.msra.mxu0 %v3108_v6  ;;  %v3156_v55 = vpack.c.bf16 %v934_v53, %v933_v52  ;;  %v935_v58 = vld [vmem:[%s3589_s22 + $0x40] sm:$0xff]  ;;  %v936_v59 = vld [vmem:[%s3589_s22 + $0x48] sm:$0xff]  ;;  %v3128_v60 = vpack.c.bf16 %v810_v57, %v809_v56  ;;  %v811_v62 = vld [vmem:[%s3581_s14 + $0x50] sm:$0xff] }
  0x24   : > { %3145 = vmatprep.subr.bf16.mxu0 %v3144_v39  ;;  %v3160_v61 = vpack.c.bf16 %v936_v59, %v935_v58  ;;  %v812_v63 = vld [vmem:[%s3581_s14 + $0x58] sm:$0xff]  ;;  %v937_v0 = vld [vmem:[%s3589_s22 + $0x50] sm:$0xff]  ;;  %v813_v4 = vld [vmem:[%s3581_s14 + $0x60] sm:$0xff] }
  0x25   : > { %3119 = vmatpush3.bf16.msra.mxu1 %v3116_v40  ;;  %v938_v1 = vld [vmem:[%s3589_s22 + $0x58] sm:$0xff]  ;;  %v3132_v2 = vpack.c.bf16 %v812_v63, %v811_v62  ;;  %v814_v5 = vld [vmem:[%s3581_s14 + $0x68] sm:$0xff]  ;;  %v939_v6 = vld [vmem:[%s3589_s22 + $0x60] sm:$0xff] }
  0x26   : > { %2978 = vmatmul.mubr.msk.f32.vlgmr.msra.gmra.mrb[0].mxu0 %vm550_vm0, %v545_v7  ;;  %3121 = vmatprep.subr.bf16.mxu1 %v3120_v48  ;;  %v3164_v3 = vpack.c.bf16 %v938_v1, %v937_v0  ;;  %v940_v7 = vld [vmem:[%s3589_s22 + $0x68] sm:$0xff]  ;;  %v2880_v35 = vld [vmem:[%s522_s12] ss:$0 sm:$0xff]  ;;  %s2894_s12 = sshll.u32 %s3536_s29, 6 }
  0x27   : > { %3147 = vmatpush3.bf16.msra.mxu0 %v3144_v39 }
  0x28   : > { %3149 = vmatprep.subr.bf16.mxu0 %v3148_v44 }
  0x29   : > { %3123 = vmatpush3.bf16.msra.mxu1 %v3120_v48 }
  0x2a   : > { %3125 = vmatprep.subr.bf16.mxu1 %v3124_v54 }
  0x2b   : > { %3151 = vmatpush3.bf16.msra.mxu0 %v3148_v44 }
  0x2c   : > { %3153 = vmatprep.subr.bf16.mxu0 %v3152_v49 }
  0x2d   : > { %3127 = vmatpush3.bf16.msra.mxu1 %v3124_v54 }
  0x2e   : > { %3129 = vmatprep.subr.bf16.mxu1 %v3128_v60 }
  0x2f   : > { %3155 = vmatpush3.bf16.msra.mxu0 %v3152_v49 }
  0x30   : > { %3157 = vmatprep.subr.bf16.mxu0 %v3156_v55 }
  0x31   : > { %3131 = vmatpush3.bf16.msra.mxu1 %v3128_v60 }
  0x32   : > { %3133 = vmatprep.subr.bf16.mxu1 %v3132_v2 }
  0x33   : > { %3159 = vmatpush3.bf16.msra.mxu0 %v3156_v55 }
  0x34   : > { %3161 = vmatprep.subr.bf16.mxu0 %v3160_v61 }
  0x35   : > { %3135 = vmatpush3.bf16.msra.mxu1 %v3132_v2 }
  0x37   : > { %3163 = vmatpush3.bf16.msra.mxu0 %v3160_v61 }
  0x38   : > { %3165 = vmatprep.subr.bf16.mxu0 %v3164_v3 }
  0x3b   : > { %3167 = vmatpush3.bf16.msra.mxu0 %v3164_v3 }
  0xf9   : > { %v3548_v8 = vpop.f32.mrb[0].mxu0 }
  0xfa   : > { %4422 = vst [vmem:[#allocation5_spill] sm:$0xff] %v3548_v8  ;;  %v3550_v9 = vpop.f32.mrb[1].mxu0  ;;  %v649_v10 = vrot.slane %v3548_v8, 7  ;;  %v653_v11 = vrot.slane %v3548_v8, 5  ;;  %v657_v12 = vrot.slane %v3548_v8, 3  ;;  %v661_v16 = vrot.slane %v3548_v8, 1 }
  0xfb   : > { %4423 = vst [vmem:[#allocation6_spill] sm:$0xff] %v3550_v9  ;;  %v648_v13 = vrot.slane %v3550_v9, 7  ;;  %v652_v14 = vrot.slane %v3550_v9, 5  ;;  %v656_v15 = vrot.slane %v3550_v9, 3  ;;  %v660_v18 = vrot.slane %v3550_v9, 1 }
  0xfc   : > { %v666_v17 = vsel %vm664_vm1, %v649_v10, %v653_v11 }
  0xfd   : > { %v665_v19 = vsel %vm664_vm1, %v648_v13, %v652_v14  ;;  %v669_v20 = vsel %vm667_vm2, %v666_v17, %v657_v12 }
  0xfe   : > { %v668_v21 = vsel %vm667_vm2, %v665_v19, %v656_v15  ;;  %v672_v22 = vsel %vm670_vm3, %v669_v20, %v661_v16  ;;  %v1019_v19 = vld [vmem:[%s3627_s13 + $0x8] sm:$0xff] }
  0xff   : > { %v671_v23 = vsel %vm670_vm3, %v668_v21, %v660_v18  ;;  %v675_v24 = vsel %vm673_vm4, %v672_v22, %v649_v10  ;;  %v3136_v10 = vpack.c.bf16 %v814_v5, %v813_v4  ;;  %v713_v21 = vlaneseq }
 0x100   : > { %v674_v25 = vsel %vm673_vm4, %v671_v23, %v648_v13  ;;  %v678_v27 = vsel %vm676_vm5, %v675_v24, %v653_v11  ;;  %v3168_v11 = vpack.c.bf16 %v940_v7, %v939_v6  ;;  %v816_v13 = vld [vmem:[%s3581_s14 + $0x78] sm:$0xff] }
 0x101   : > { %v677_v26 = vsel %vm676_vm5, %v674_v25, %v652_v14  ;;  %v681_v30 = vsel %vm679_vm6, %v678_v27, %v657_v12  ;;  %v815_v12 = vld [vmem:[%s3581_s14 + $0x70] sm:$0xff]  ;;  %3137 = vmatprep.subr.bf16.mxu1 %v3136_v10  ;;  %s2869_s14 = sshll.u32 %s3536_s29, 2  ;;  %v3635_v22 = vshrl.u32 %v713_v21, 7 }
 0x102   : > { %v680_v28 = vsel %vm679_vm6, %v677_v26, %v656_v15  ;;  %v684_v34 = vsel %vm682_vm7, %v681_v30, %v661_v16  ;;  %v3140_v14 = vpack.c.bf16 %v816_v13, %v815_v12  ;;  %3169 = vmatprep.subr.bf16.mxu0 %v3168_v11  ;;  %3139 = vmatpush3.bf16.msra.mxu1 %v3136_v10  ;;  %v941_v15 = vld [vmem:[%s3589_s22 + $0x70] sm:$0xff]  ;;  %v942_v16 = vld [vmem:[%s3589_s22 + $0x78] sm:$0xff]  ;;  %s519_s16 = scalar_lea.vmem %s4403_s3, %s2869_s14  ;;  %s543_s14 = scalar_lea.vmem %s4409_s9, %s3536_s29 }
 0x103   : > { %v683_v29 = vsel %vm682_vm7, %v680_v28, %v660_v18  ;;  %3171 = vmatpush3.bf16.msra.mxu0 %v3168_v11  ;;  %v3172_v17 = vpack.c.bf16 %v942_v16, %v941_v15  ;;  %v1018_v18 = vld [vmem:[%s3627_s13] sm:$0xff]  ;;  %v3641_v23 = vsub.s32 1, %v3635_v22  ;;  %v3644_v24 = vsub.s32 2, %v3635_v22  ;;  %s498_s29 = sand.u32 1, %s3411_s18  }
 0x104   : > { %687 = vrot.lane.b32.xlu0 %v683_v29, %s3421_s25  ;;  %3141 = vmatprep.subr.bf16.mxu1 %v3140_v14  ;;  %v3631_v20 = vpack.c.bf16 %v1019_v19, %v1018_v18  ;;  %v3647_v25 = vsub.s32 3, %v3635_v22  ;;  %v696_v26 = vld [vmem:[%s519_s16] sm:$0xf]  ;;  %v3650_v27 = vsub.s32 0, %v3635_v22  ;;  %s2898_s16 = sshll.u32 %s3507_s21, 8  ;;  %s3423_s21 = smov [#allocation2]  }
 0x105   : > { %3173 = vmatprep.subr.bf16.mxu0 %v3172_v17  ;;  %v724_v28 = vrot.slane %v696_v26, %v3641_v23  ;;  %v746_v29 = vrot.slane %v696_v26, %v3644_v24 }
 0x106   : > { %3143 = vmatpush3.bf16.msra.mxu1 %v3140_v14  ;;  %v768_v30 = vrot.slane %v696_v26, %v3647_v25  ;;  %v716_v32 = vrot.slane %v696_v26, %v3650_v27 }
 0x107   : > { %3175 = vmatpush3.bf16.msra.mxu0 %v3172_v17  ;;  %3177 = vmatprep.subr.bf16.mxu1 %v3631_v20 }
 0x108   : > { %689 = vrot.lane.b32.xlu0 %v684_v34, %s3421_s25 }
 0x176   : > { %v688_v31 = vpop.permute.xlu0 %687 }
 0x177   : > { %v694_v33 = vsel %vm693_vm8, %v3550_v9, %v688_v31 }
 0x178   : > { %v699_v34 = vrot.slane %v694_v33, 5  ;;  %v1020_v33 = vld [vmem:[%s3627_s13 + $0x10] sm:$0xff] }
 0x17a   : > { %v703_v36 = vsel %vm670_vm3, 0.0, %v699_v34  ;;  %v726_v37 = vmul.f32 %v724_v28, %v699_v34  ;;  %v748_v38 = vmul.f32 %v746_v29, %v699_v34  ;;  %v770_v39 = vmul.f32 %v768_v30, %v699_v34  ;;  %v690_v40 = vpop.permute.xlu0 %689  ;;  %v1021_v34 = vld [vmem:[%s3627_s13 + $0x18] sm:$0xff] }
 0x17b   : > { %v717_v41 = vmul.f32 %v716_v32, %v703_v36  ;;  %v725_v42 = vmul.f32 %v724_v28, %v703_v36  ;;  %v747_v43 = vmul.f32 %v746_v29, %v703_v36  ;;  %v769_v44 = vmul.f32 %v768_v30, %v703_v36 }
 0x17c   : > { %v734_v45 = vrot.slane %v726_v37, 1  ;;  %v756_v46 = vrot.slane %v748_v38, 2  ;;  %v695_v47 = vsel %vm693_vm8, %v3548_v8, %v690_v40  ;;  %v778_v52 = vrot.slane %v770_v39, 3  ;;  %v1022_v38 = vld [vmem:[%s3627_s13 + $0x20] sm:$0xff]  ;;  %v1023_v39 = vld [vmem:[%s3627_s13 + $0x28] sm:$0xff] }
 0x17d   : > { %v719_v48 = vadd.f32 %v2880_v35, %v717_v41  ;;  %v733_v49 = vrot.slane %v725_v42, 1  ;;  %v755_v50 = vrot.slane %v747_v43, 2  ;;  %v777_v51 = vrot.slane %v769_v44, 3  ;;  %v1024_v41 = vld [vmem:[%s3627_s13 + $0x30] sm:$0xff]  ;;  %v1025_v42 = vld [vmem:[%s3627_s13 + $0x38] sm:$0xff]  ;;  %v1026_v44 = vld [vmem:[%s3627_s13 + $0x40] sm:$0xff] }
 0x17e   : > { %v700_v53 = vrot.slane %v695_v47, 5  ;;  %v3180_v37 = vpack.c.bf16 %v1021_v34, %v1020_v33  ;;  %v3184_v40 = vpack.c.bf16 %v1023_v39, %v1022_v38  ;;  %v3188_v43 = vpack.c.bf16 %v1025_v42, %v1024_v41  ;;  %v1028_v47 = vld [vmem:[%s3627_s13 + $0x50] sm:$0xff] }
 0x17f   : > { %v735_v54 = vsel %vm682_vm7, %v733_v49, %v734_v45  ;;  %v757_v55 = vsel %vm679_vm6, %v755_v50, %v756_v46  ;;  %v779_v3 = vsel %vm676_vm5, %v777_v51, %v778_v52  ;;  %v1027_v45 = vld [vmem:[%s3627_s13 + $0x48] sm:$0xff]  ;;  %v1030_v49 = vld [vmem:[%s3627_s13 + $0x60] sm:$0xff]  ;;  %v1032_v52 = vld [vmem:[%s3627_s13 + $0x70] sm:$0xff] }
 0x180   : > { %v741_v56 = vadd.f32 %v735_v54, %v719_v48  ;;  %v704_v57 = vsel %vm670_vm3, 0.0, %v700_v53  ;;  %v728_v58 = vmul.f32 %v724_v28, %v700_v53  ;;  %v750_v59 = vmul.f32 %v746_v29, %v700_v53  ;;  %v1031_v50 = vld [vmem:[%s3627_s13 + $0x68] sm:$0xff] }
 0x181   : > { %v718_v60 = vmul.f32 %v716_v32, %v704_v57  ;;  %v727_v61 = vmul.f32 %v724_v28, %v704_v57  ;;  %v749_v62 = vmul.f32 %v746_v29, %v704_v57  ;;  %v771_v63 = vmul.f32 %v768_v30, %v704_v57 }
 0x182   : > { %v737_v0 = vrot.slane %v728_v58, 1  ;;  %v772_v1 = vmul.f32 %v768_v30, %v700_v53  ;;  %v763_v2 = vadd.f32 %v757_v55, %v741_v56  ;;  %v759_v7 = vrot.slane %v750_v59, 2  ;;  %v1033_v53 = vld [vmem:[%s3627_s13 + $0x78] sm:$0xff] }
 0x183   : > { %v720_v4 = vadd.f32 %v2880_v35, %v718_v60  ;;  %v736_v5 = vrot.slane %v727_v61, 1  ;;  %v758_v6 = vrot.slane %v749_v62, 2  ;;  %v780_v12 = vrot.slane %v771_v63, 3 }
 0x184   : > { %v785_v10 = vadd.f32 %v779_v3, %v763_v2  ;;  %v781_v13 = vrot.slane %v772_v1, 3  ;;  %v3192_v46 = vpack.c.bf16 %v1027_v45, %v1026_v44  ;;  %v3200_v51 = vpack.c.bf16 %v1031_v50, %v1030_v49 }
 0x185   : > { %v738_v11 = vsel %vm682_vm7, %v736_v5, %v737_v0  ;;  %v760_v16 = vsel %vm679_vm6, %v758_v6, %v759_v7  ;;  %v3204_v54 = vpack.c.bf16 %v1033_v53, %v1032_v52  ;;  %v3708_v63 = vsub.s32 4, %v3635_v22 }
 0x186   : > { %v742_v14 = vadd.f32 %v738_v11, %v720_v4  ;;  %v2881_v15 = vmul.f32 -1.442695, %v785_v10  ;;  %v782_v18 = vsel %vm676_vm5, %v780_v12, %v781_v13  ;;  %v3716_v3 = vsub.s32 5, %v3635_v22 }
 0x187   : > { %v3720_v5 = vsub.s32 6, %v3635_v22  ;;  %v3724_v7 = vsub.s32 7, %v3635_v22  ;;  %v3422_v50 = vmov 1966171168  }
 0x188   : > { %3267 = vpow2.f32 %v2881_v15  ;;  %v764_v17 = vadd.f32 %v760_v16, %v742_v14  ;;  %v3741_v16 = vld [vmem:[%s530_s30] ss:$0 sm:$0xff]  ;;  %s4209_s30 = scalar_lea.vmem %s4402_s2, %s2894_s12  ;;  %s4355_s12 = scalar_lea.hbm %s4411_s11, %s2898_s16 }
 0x18a   : > { %v786_v19 = vadd.f32 %v782_v18, %v764_v17 }
 0x18c   : > { %v2882_v21 = vmul.f32 -1.442695, %v786_v19 }
 0x18e   : > { %3269 = vpow2.f32 %v2882_v21 }
 0x192   : > { %v3268_v26 = vpop.eup %3267 }
 0x193   : > { %v793_v28 = vadd.f32 1.0, %v3268_v26 }
 0x195   : > { %3271 = vrcp.f32 %v793_v28 }
 0x198   : > { %v3270_v29 = vpop.eup %3269 }
 0x199   : > { %v794_v30 = vadd.f32 1.0, %v3270_v29 }
 0x19b   : > { %3273 = vrcp.f32 %v794_v30 }
 0x19f   : > { %v3272_v31 = vpop.eup %3271 }
 0x1a0   : > { %v3672_v32 = vmul.f32 %v3272_v31, %v785_v10 }
 0x1a2   : > { %4424 = vst [vmem:[#allocation7_spill] sm:$0xff] %v3672_v32  ;;  %3012 = vmatprep.mubr.f32.mxu1 %v3672_v32  ;;  %3047 = vmatprep.mubr.f32.mxu0 %v3672_v32 }
 0x1a5   : > { %v3274_v35 = vpop.eup %3273 }
 0x1a6   : > { %v3678_v36 = vmul.f32 %v3274_v35, %v786_v19 }
 0x1a8   : > { %4425 = vst [vmem:[#allocation8_spill] sm:$0xff] %v3678_v36  ;;  %3013 = vmatmul.mubr.f32.vlgmr.msra.gmra.mrb[0].mxu1 %v3678_v36  ;;  %3048 = vmatmul.mubr.f32.vlgmr.msra.gmra.mrb[2].mxu0 %v3678_v36 }
 0x1a9   : > { %3179 = vmatpush3.bf16.msra.mxu1 %v3631_v20  ;;  %3082 = vmatprep.mubr.f32.mxu1 %v3672_v32  ;;  %v1029_v20 = vld [vmem:[%s3627_s13 + $0x58] sm:$0xff]  ;;  %s4359_s13 = scalar_lea.sflag [#allocation3], %s498_s29 }
 0x1aa   : > { %3181 = vmatprep.subr.bf16.mxu1 %v3180_v37  ;;  %v3196_v48 = vpack.c.bf16 %v1029_v20, %v1028_v47 }
 0x1ad   : > { %3183 = vmatpush3.bf16.msra.mxu1 %v3180_v37 }
 0x1ae   : > { %3185 = vmatprep.subr.bf16.mxu1 %v3184_v40 }
 0x1b1   : > { %3187 = vmatpush3.bf16.msra.mxu1 %v3184_v40 }
 0x1b2   : > { %3189 = vmatprep.subr.bf16.mxu1 %v3188_v43 }
 0x1b5   : > { %3191 = vmatpush3.bf16.msra.mxu1 %v3188_v43 }
 0x1b6   : > { %3193 = vmatprep.subr.bf16.mxu1 %v3192_v46 }
 0x1b9   : > { %3195 = vmatpush3.bf16.msra.mxu1 %v3192_v46 }
 0x1ba   : > { %3197 = vmatprep.subr.bf16.mxu1 %v3196_v48 }
 0x1bd   : > { %3199 = vmatpush3.bf16.msra.mxu1 %v3196_v48 }
 0x1be   : > { %3201 = vmatprep.subr.bf16.mxu1 %v3200_v51 }
 0x1c1   : > { %3203 = vmatpush3.bf16.msra.mxu1 %v3200_v51  ;;  %v1115_v51 = vunpack.c.l.s4 %v3422_v50 }
 0x1c2   : > { %3205 = vmatprep.subr.bf16.mxu1 %v3204_v54 }
 0x1c5   : > { %3207 = vmatpush3.bf16.msra.mxu1 %v3204_v54 }
 0x1c8   : > { %3083 = vmatmul.mubr.f32.vlgmr.msra.gmra.mrb[2].mxu1 %v3678_v36 }
 0x27b   : > { %v3697_v55 = vpop.f32.mrb[0].mxu1  ;;  %v3049_v56 = vpop.f32.mrb[2].mxu0 }
 0x27c   : > { %v3699_v57 = vpop.f32.mrb[1].mxu1  ;;  %v3701_v58 = vpop.f32.mrb[3].mxu0  ;;  %v1480_v59 = vrot.slane %v3049_v56, %v3650_v27  ;;  %v1491_v60 = vrot.slane %v3049_v56, %v3641_v23  ;;  %v1502_v61 = vrot.slane %v3049_v56, %v3644_v24  ;;  %v1513_v62 = vrot.slane %v3049_v56, %v3647_v25 }
 0x27d   : > { %v1524_v2 = vrot.slane %v3049_v56, %v3708_v63  ;;  %v1535_v4 = vrot.slane %v3049_v56, %v3716_v3  ;;  %v1546_v6 = vrot.slane %v3049_v56, %v3720_v5  ;;  %v1557_v10 = vrot.slane %v3049_v56, %v3724_v7 }
 0x27e   : > { %1486 = vbcast.lane.b32.xlu1 %v1480_v59, 264  ;;  %1482 = vbcast.lane.b32.xlu0 %v1480_v59, 256  ;;  %v1392_v11 = vrot.slane %v3701_v58, %v3650_v27  ;;  %v1403_v12 = vrot.slane %v3701_v58, %v3641_v23  ;;  %v1414_v13 = vrot.slane %v3701_v58, %v3644_v24 }
 0x27f   : > { %v1425_v14 = vrot.slane %v3701_v58, %v3647_v25  ;;  %v1436_v15 = vrot.slane %v3701_v58, %v3708_v63  ;;  %v3745_v17 = vadd.f32 %v3741_v16, %v3699_v57  ;;  %v1447_v18 = vrot.slane %v3701_v58, %v3716_v3 }
 0x280   : > { %v1458_v26 = vrot.slane %v3701_v58, %v3720_v5  ;;  %v1469_v33 = vrot.slane %v3701_v58, %v3724_v7 }
 0x281   : > { %v901_v19 = vmin.f32 %v3745_v17, 20.0  ;;  %vm899_vm10 = vcmp.gt.f32.partialorder %v3745_v17, 20.0 }
 0x282   : > { %1847 = vbcast.lane.b32.xlu1 %v1480_v59, 280  ;;  %1843 = vbcast.lane.b32.xlu0 %v1480_v59, 272  ;;  %v1116_v59 = vunpack.c.0.s8 %v1115_v51 }
 0x283   : > { %v903_v21 = vmul.f32 1.442695, %v901_v19 }
 0x285   : > { %3275 = vpow2.f32 %v903_v21 }
 0x286   : > { %1497 = vbcast.lane.b32.xlu1 %v1491_v60, 264  ;;  %1493 = vbcast.lane.b32.xlu0 %v1491_v60, 256 }
 0x28a   : > { %1855 = vbcast.lane.b32.xlu1 %v1491_v60, 280  ;;  %1851 = vbcast.lane.b32.xlu0 %v1491_v60, 272 }
 0x28e   : > { %1508 = vbcast.lane.b32.xlu1 %v1502_v61, 264  ;;  %1504 = vbcast.lane.b32.xlu0 %v1502_v61, 256 }
 0x28f   : > { %v3276_v37 = vpop.eup %3275 }
 0x290   : > { %v907_v40 = vadd.f32 1.0, %v3276_v37  ;;  %v910_v47 = vmul.f32 -0.5, %v3276_v37  ;;  %v913_v56 = vand.u32 2147483647, %v3276_v37 }
 0x292   : > { %1863 = vbcast.lane.b32.xlu1 %v1502_v61, 280  ;;  %1859 = vbcast.lane.b32.xlu0 %v1502_v61, 272  ;;  %3277 = vlog2.f32 %v907_v40  ;;  %v911_v52 = vadd.f32 1.0, %v910_v47  ;;  %vm914_vm9 = vcmp.lt.f32.partialorder %v913_v56, 0.0004427343 }
 0x294   : > { %v912_v60 = vmul.f32 %v3276_v37, %v911_v52  ;;  %v3830_v37 = vld [vmem:[%s4410_s10] sm:$0xff]  ;;  %v3845_v52 = vld [vmem:[%s4410_s10 + $0x8] sm:$0xff] }
 0x296   : > { %1519 = vbcast.lane.b32.xlu1 %v1513_v62, 264  ;;  %1515 = vbcast.lane.b32.xlu0 %v1513_v62, 256 }
 0x29a   : > { %1871 = vbcast.lane.b32.xlu1 %v1513_v62, 280  ;;  %1867 = vbcast.lane.b32.xlu0 %v1513_v62, 272 }
 0x29b   : > { %v3710_v0 = vpop.f32.mrb[2].mxu1 }
 0x29c   : > { %v3712_v1 = vpop.f32.mrb[3].mxu1  ;;  %v2060_v41 = vrot.slane %v3710_v0, %v3650_v27  ;;  %v2071_v44 = vrot.slane %v3710_v0, %v3641_v23  ;;  %v3278_v49 = vpop.eup %3277  ;;  %v2082_v58 = vrot.slane %v3710_v0, %v3644_v24  ;;  %v2104_v19 = vrot.slane %v3710_v0, %v3708_v63 }
 0x29d   : > { %v909_v57 = vmul.f32 0.6931472, %v3278_v49  ;;  %v2115_v50 = vrot.slane %v3710_v0, %v3716_v3 }
 0x29e   : > { %1530 = vbcast.lane.b32.xlu1 %v1524_v2, 264  ;;  %1526 = vbcast.lane.b32.xlu0 %v1524_v2, 256 }
 0x2a2   : > { %1879 = vbcast.lane.b32.xlu1 %v1524_v2, 280  ;;  %1875 = vbcast.lane.b32.xlu0 %v1524_v2, 272  ;;  %v915_v2 = vsel %vm914_vm9, %v912_v60, %v909_v57 }
 0x2a6   : > { %1541 = vbcast.lane.b32.xlu1 %v1535_v4, 264  ;;  %1537 = vbcast.lane.b32.xlu0 %v1535_v4, 256 }
 0x2aa   : > { %1887 = vbcast.lane.b32.xlu1 %v1535_v4, 280  ;;  %1883 = vbcast.lane.b32.xlu0 %v1535_v4, 272  ;;  %v3797_v4 = vsub.s32 %v1116_v59, %v3635_v22 }
 0x2ae   : > { %1552 = vbcast.lane.b32.xlu1 %v1546_v6, 264  ;;  %1548 = vbcast.lane.b32.xlu0 %v1546_v6, 256 }
 0x2b2   : > { %1895 = vbcast.lane.b32.xlu1 %v1546_v6, 280  ;;  %1891 = vbcast.lane.b32.xlu0 %v1546_v6, 272 }
 0x2b6   : > { %1563 = vbcast.lane.b32.xlu1 %v1557_v10, 264  ;;  %1559 = vbcast.lane.b32.xlu0 %v1557_v10, 256 }
 0x2ba   : > { %1903 = vbcast.lane.b32.xlu1 %v1557_v10, 280  ;;  %1899 = vbcast.lane.b32.xlu0 %v1557_v10, 272  ;;  %v3803_v10 = vsel %vm899_vm10, %v3745_v17, %v915_v2  ;;  %v3818_v17 = vadd.f32 %v3697_v55, %v3741_v16 }
 0x2bc   : > { %v902_v55 = vmin.f32 %v3818_v17, 20.0  ;;  %vm900_vm12 = vcmp.gt.f32.partialorder %v3818_v17, 20.0 }
 0x2be   : > { %1779 = vbcast.lane.b32.xlu0 %v1392_v11, 272  ;;  %1394 = vbcast.lane.b32.xlu1 %v1392_v11, 256  ;;  %v905_v47 = vmul.f32 1.442695, %v902_v55 }
 0x2c0   : > { %3279 = vpow2.f32 %v905_v47 }
 0x2c2   : > { %1405 = vbcast.lane.b32.xlu0 %v1403_v12, 256  ;;  %1398 = vbcast.lane.b32.xlu1 %v1392_v11, 264 }
 0x2c6   : > { %1787 = vbcast.lane.b32.xlu0 %v1403_v12, 272  ;;  %1783 = vbcast.lane.b32.xlu1 %v1392_v11, 280 }
 0x2ca   : > { %1416 = vbcast.lane.b32.xlu0 %v1414_v13, 256  ;;  %1409 = vbcast.lane.b32.xlu1 %v1403_v12, 264 }
 0x2ce   : > { %1795 = vbcast.lane.b32.xlu0 %v1414_v13, 272  ;;  %1791 = vbcast.lane.b32.xlu1 %v1403_v12, 280  ;;  %v2093_v12 = vrot.slane %v3710_v0, %v3647_v25 }
 0x2d2   : > { %1427 = vbcast.lane.b32.xlu0 %v1425_v14, 256  ;;  %1420 = vbcast.lane.b32.xlu1 %v1414_v13, 264 }
 0x2d6   : > { %1803 = vbcast.lane.b32.xlu0 %v1425_v14, 272  ;;  %1799 = vbcast.lane.b32.xlu1 %v1414_v13, 280  ;;  %v1120_v13 = vrot.slane %v3803_v10, %v3797_v4 }
 0x2da   : > { %1438 = vbcast.lane.b32.xlu0 %v1436_v15, 256  ;;  %1431 = vbcast.lane.b32.xlu1 %v1425_v14, 264 }
 0x2de   : > { %1811 = vbcast.lane.b32.xlu0 %v1436_v15, 272  ;;  %1807 = vbcast.lane.b32.xlu1 %v1425_v14, 280 }
 0x2e2   : > { %1449 = vbcast.lane.b32.xlu0 %v1447_v18, 256  ;;  %1442 = vbcast.lane.b32.xlu1 %v1436_v15, 264 }
 0x2e6   : > { %1819 = vbcast.lane.b32.xlu0 %v1447_v18, 272  ;;  %1815 = vbcast.lane.b32.xlu1 %v1436_v15, 280  ;;  %v1136_v15 = vrot.slane %v1120_v13, %v3797_v4 }
 0x2e8   : > { %v1214_v21 = vrot.slane %v1136_v15, %v3650_v27  ;;  %v1158_v56 = vcombine.high %v1136_v15, %v1136_v15 }
 0x2ea   : > { %1460 = vbcast.lane.b32.xlu0 %v1458_v26, 256  ;;  %1453 = vbcast.lane.b32.xlu1 %v1447_v18, 264  ;;  %v1291_v40 = vmul.f32 %v1214_v21, %v3830_v37  ;;  %v1292_v2 = vmul.f32 %v1214_v21, %v3845_v52 }
 0x2ec   : > { %v1323_v51 = vmul.f32 1.442695, %v1291_v40  ;;  %v2126_v40 = vrot.slane %v3710_v0, %v3720_v5  ;;  %v1325_v47 = vmul.f32 1.442695, %v1292_v2  ;;  %v3877_v2 = vpop.eup %3279 }
 0x2ee   : > { %1827 = vbcast.lane.b32.xlu0 %v1458_v26, 272  ;;  %1823 = vbcast.lane.b32.xlu1 %v1447_v18, 280  ;;  %v1128_v18 = vcombine.high %v1120_v13, %v1120_v13  ;;  %3281 = vpow2.f32 %v1323_v51  ;;  %v1113_v51 = vcombine.high %v3803_v10, %v3803_v10 }
 0x2f0   : > { %v3752_v28 = vpop.permute.xlu1 %1486  ;;  %v3754_v29 = vpop.permute.xlu0 %1482  ;;  %v1150_v16 = vrot.slane %v1128_v18, %v3797_v4 }
 0x2f2   : > { %1471 = vbcast.lane.b32.xlu0 %v1469_v33, 256  ;;  %1464 = vbcast.lane.b32.xlu1 %v1458_v26, 264  ;;  %v1218_v49 = vrot.slane %v1150_v16, %v3650_v27  ;;  %v1160_v21 = vcombine.high %v1150_v16, %v1150_v16 }
 0x2f4   : > { %v3756_v30 = vpop.permute.xlu1 %1847  ;;  %v3758_v31 = vpop.permute.xlu0 %1843  ;;  %v1293_v57 = vmul.f32 %v1218_v49, %v3830_v37  ;;  %v1226_v8 = vrot.slane %v1160_v21, %v3650_v27 }
 0x2f6   : > { %1835 = vbcast.lane.b32.xlu0 %v1469_v33, 272  ;;  %1831 = vbcast.lane.b32.xlu1 %v1458_v26, 280  ;;  %v1327_v13 = vmul.f32 1.442695, %v1293_v57 }
 0x2f8   : > { %v3762_v34 = vpop.permute.xlu1 %1497  ;;  %v3764_v35 = vpop.permute.xlu0 %1493  ;;  %3283 = vpow2.f32 %v1327_v13 }
 0x2f9   : > { %3285 = vpow2.f32 %v1325_v47  ;;  %v3889_v47 = vrot.slane %v3710_v0, %v3724_v7 }
 0x2fa   : > { %1475 = vbcast.lane.b32.xlu1 %v1469_v33, 264  ;;  %2062 = vbcast.lane.b32.xlu0 %v2060_v41, 256 }
 0x2fc   : > { %v3766_v38 = vpop.permute.xlu1 %1855  ;;  %v3768_v39 = vpop.permute.xlu0 %1851 }
 0x2fe   : > { %1839 = vbcast.lane.b32.xlu1 %v1469_v33, 280  ;;  %2073 = vbcast.lane.b32.xlu0 %v2071_v44, 256 }
 0x300   : > { %v3772_v42 = vpop.permute.xlu1 %1508  ;;  %v3774_v43 = vpop.permute.xlu0 %1504 }
 0x302   : > { %2066 = vbcast.lane.b32.xlu1 %v2060_v41, 264  ;;  %2211 = vbcast.lane.b32.xlu0 %v2060_v41, 272 }
 0x304   : > { %v3778_v45 = vpop.permute.xlu1 %1863  ;;  %v3780_v46 = vpop.permute.xlu0 %1859 }
 0x306   : > { %2077 = vbcast.lane.b32.xlu1 %v2071_v44, 264  ;;  %2219 = vbcast.lane.b32.xlu0 %v2071_v44, 272 }
 0x308   : > { %v3782_v20 = vpop.permute.xlu1 %1519  ;;  %v3784_v48 = vpop.permute.xlu0 %1515 }
 0x30a   : > { %2215 = vbcast.lane.b32.xlu1 %v2060_v41, 280  ;;  %2084 = vbcast.lane.b32.xlu0 %v2082_v58, 256 }
 0x30c   : > { %v3786_v53 = vpop.permute.xlu1 %1871  ;;  %v3788_v54 = vpop.permute.xlu0 %1867 }
 0x30e   : > { %2223 = vbcast.lane.b32.xlu1 %v2071_v44, 280  ;;  %2227 = vbcast.lane.b32.xlu0 %v2082_v58, 272 }
 0x310   : > { %v3792_v61 = vpop.permute.xlu1 %1530  ;;  %v3794_v62 = vpop.permute.xlu0 %1526 }
 0x311   : > { %4426 = vst [vmem:[#allocation9_spill] sm:$0xff] %v3792_v61  ;;  %4427 = vst [vmem:[#allocation10_spill] sm:$0xff] %v3794_v62 }
 0x312   : > { %2088 = vbcast.lane.b32.xlu1 %v2082_v58, 264  ;;  %2095 = vbcast.lane.b32.xlu0 %v2093_v12, 256 }
 0x314   : > { %v3800_v6 = vpop.permute.xlu1 %1879  ;;  %v3805_v11 = vpop.permute.xlu0 %1875 }
 0x315   : > { %4428 = vst [vmem:[#allocation11_spill] sm:$0xff] %v3800_v6 }
 0x316   : > { %2231 = vbcast.lane.b32.xlu1 %v2082_v58, 280  ;;  %2235 = vbcast.lane.b32.xlu0 %v2093_v12, 272  ;;  %v3850_v58 = vmul.f32 %v3803_v10, %v3672_v32  ;;  %v1127_v10 = vrot.slane %v1113_v51, %v3797_v4 }
 0x318   : > { %v3811_v22 = vpop.permute.xlu1 %1541  ;;  %v3813_v14 = vpop.permute.xlu0 %1537  ;;  %v1574_v15 = vrot.slane %v3850_v58, %v3797_v4 }
 0x319   : > { %4429 = vst [vmem:[#allocation12_spill] sm:$0xff] %v3811_v22  ;;  %4430 = vst [vmem:[#allocation13_spill] sm:$0xff] %v3813_v14  ;;  %v1129_v22 = vcombine.high %v1127_v10, %v1127_v10 }
 0x31a   : > { %2099 = vbcast.lane.b32.xlu1 %v2093_v12, 264  ;;  %2106 = vbcast.lane.b32.xlu0 %v2104_v19, 256  ;;  %v1582_v57 = vcombine.high %v1574_v15, %v1574_v15  ;;  %v3871_v32 = vrot.slane %v1574_v15, %v3797_v4 }
 0x31c   : > { %v3823_v26 = vpop.permute.xlu1 %1887  ;;  %v3825_v33 = vpop.permute.xlu0 %1883  ;;  %v1668_v15 = vrot.slane %v3871_v32, %v3650_v27  ;;  %v3884_v9 = vrot.slane %v1582_v57, %v3797_v4  ;;  %v1297_v57 = vmul.f32 %v1226_v8, %v3830_v37 }
 0x31d   : > { %4431 = vst [vmem:[#allocation14_spill] sm:$0xff] %v3823_v26  ;;  %4432 = vst [vmem:[#allocation15_spill] sm:$0xff] %v3825_v33  ;;  %v1612_v26 = vcombine.high %v3871_v32, %v3871_v32 }
 0x31e   : > { %2239 = vbcast.lane.b32.xlu1 %v2093_v12, 280  ;;  %2243 = vbcast.lane.b32.xlu0 %v2104_v19, 272  ;;  %v1222_v12 = vrot.slane %v1158_v56, %v3650_v27 }
 0x320   : > { %v3835_v41 = vpop.permute.xlu1 %1552  ;;  %v3837_v44 = vpop.permute.xlu0 %1548  ;;  %v1295_v56 = vmul.f32 %v1222_v12, %v3830_v37  ;;  %v1296_v21 = vmul.f32 %v1222_v12, %v3845_v52 }
 0x321   : > { %4433 = vst [vmem:[#allocation16_spill] sm:$0xff] %v3835_v41  ;;  %4434 = vst [vmem:[#allocation17_spill] sm:$0xff] %v3837_v44  ;;  %v3902_v44 = vrot.slane %v3712_v1, %v3650_v27 }
 0x322   : > { %2110 = vbcast.lane.b32.xlu1 %v2104_v19, 264  ;;  %2117 = vbcast.lane.b32.xlu0 %v2115_v50, 256  ;;  %v1331_v13 = vmul.f32 1.442695, %v1295_v56 }
 0x324   : > { %v3852_v59 = vpop.permute.xlu1 %1895  ;;  %v3854_v60 = vpop.permute.xlu0 %1891 }
 0x325   : > { %4435 = vst [vmem:[#allocation18_spill] sm:$0xff] %v3852_v59  ;;  %4436 = vst [vmem:[#allocation19_spill] sm:$0xff] %v3854_v60  ;;  %v1672_v59 = vrot.slane %v3884_v9, %v3650_v27  ;;  %v1333_v60 = vmul.f32 1.442695, %v1296_v21  ;;  %v3918_v21 = vrot.slane %v1129_v22, %v3797_v4  ;;  %v3927_v22 = vrot.slane %v1612_v26, %v3650_v27 }
 0x326   : > { %2247 = vbcast.lane.b32.xlu1 %v2104_v19, 280  ;;  %2251 = vbcast.lane.b32.xlu0 %v2115_v50, 272  ;;  %v1294_v19 = vmul.f32 %v1218_v49, %v3845_v52  ;;  %v3282_v49 = vpop.eup %3281  ;;  %v1567_v26 = vcombine.high %v3850_v58, %v3850_v58 }
 0x327   : > { %v2305_v56 = vmul.f32 0.0, %v3282_v49 }
 0x328   : > { %v3860_v18 = vpop.permute.xlu1 %1563  ;;  %v3862_v55 = vpop.permute.xlu0 %1559  ;;  %v1329_v16 = vmul.f32 1.442695, %v1294_v19  ;;  %v3892_v19 = vrot.slane %v1127_v10, %v3797_v4  ;;  %v3915_v10 = vrot.slane %v3712_v1, %v3641_v23 }
 0x329   : > { %4437 = vst [vmem:[#allocation20_spill] sm:$0xff] %v3860_v18  ;;  %4438 = vst [vmem:[#allocation21_spill] sm:$0xff] %v3862_v55 }
 0x32a   : > { %2121 = vbcast.lane.b32.xlu1 %v2115_v50, 264  ;;  %2128 = vbcast.lane.b32.xlu0 %v2126_v40, 256  ;;  %3287 = vpow2.f32 %v1329_v16  ;;  %v3284_v16 = vpop.eup %3283  ;;  %v1159_v58 = vcombine.high %v3892_v19, %v3892_v19 }
 0x32b   : > { %3289 = vpow2.f32 %v1331_v13  ;;  %v1230_v13 = vrot.slane %v3892_v19, %v3650_v27 }
 0x32c   : > { %v3873_v55 = vpop.permute.xlu1 %1903  ;;  %v3875_v18 = vpop.permute.xlu0 %1899 }
 0x32d   : > { %4439 = vst [vmem:[#allocation22_spill] sm:$0xff] %v3873_v55  ;;  %4440 = vst [vmem:[#allocation23_spill] sm:$0xff] %v3875_v18  ;;  %v916_v18 = vadd.f32 1.0, %v3877_v2 }
 0x32e   : > { %2255 = vbcast.lane.b32.xlu1 %v2115_v50, 280  ;;  %2259 = vbcast.lane.b32.xlu0 %v2126_v40, 272 }
 0x32f   : > { %3291 = vlog2.f32 %v916_v18 }
 0x330   : > { %v1780_v55 = vpop.permute.xlu0 %1779  ;;  %v1395_v41 = vpop.permute.xlu1 %1394  ;;  %3293 = vpow2.f32 %v1333_v60 }
 0x331   : > { %v1905_v50 = vmul.f32 %v1780_v55, %v1668_v15  ;;  %v1745_v51 = vmul.f32 %v1668_v15, %v1395_v41 }
 0x332   : > { %2132 = vbcast.lane.b32.xlu1 %v2126_v40, 264  ;;  %2139 = vbcast.lane.b32.xlu0 %v3889_v47, 256 }
 0x333   : > { %v1937_v0 = vsel %vm693_vm8, %v1745_v51, %v1905_v50  ;;  %v3286_v50 = vpop.eup %3285  ;;  %v1335_v51 = vmul.f32 1.442695, %v1297_v57  ;;  %v1299_v57 = vmul.f32 %v1230_v13, %v3830_v37 }
 0x334   : > { %v1406_v41 = vpop.permute.xlu0 %1405  ;;  %v1399_v55 = vpop.permute.xlu1 %1398  ;;  %v3904_v12 = vadd.f32 %v2305_v56, %v1937_v0  ;;  %v919_v56 = vmul.f32 -0.5, %v3877_v2  ;;  %v2306_v32 = vmul.f32 0.0, %v3286_v50  ;;  %v1234_v50 = vrot.slane %v3918_v21, %v3650_v27 }
 0x335   : > { %v1747_v49 = vmul.f32 %v1672_v59, %v1406_v41  ;;  %3295 = vpow2.f32 %v1335_v51 }
 0x336   : > { %4441 = vst [vmem:[#allocation24_spill] sm:$0xff] %v3904_v12  ;;  %2263 = vbcast.lane.b32.xlu1 %v2126_v40, 280  ;;  %1974 = vbcast.lane.b32.xlu0 %v3902_v44, 256  ;;  %v2331_v18 = vmul.f32 %v3284_v16, %v3904_v12  ;;  %v1746_v40 = vmul.f32 %v1668_v15, %v1399_v55  ;;  %v3288_v55 = vpop.eup %3287 }
 0x337   : > { %v1298_v16 = vmul.f32 %v1226_v8, %v3845_v52  ;;  %v3290_v33 = vpop.eup %3289 }
 0x338   : > { %v1788_v0 = vpop.permute.xlu0 %1787  ;;  %v1784_v14 = vpop.permute.xlu1 %1783 }
 0x339   : > { %v1907_v41 = vmul.f32 %v1788_v0, %v1672_v59  ;;  %v1906_v61 = vmul.f32 %v1784_v14, %v1668_v15  ;;  %v920_v14 = vadd.f32 1.0, %v919_v56  ;;  %v1337_v51 = vmul.f32 1.442695, %v1298_v16 }
 0x33a   : > { %2143 = vbcast.lane.b32.xlu1 %v3889_v47, 264  ;;  %1985 = vbcast.lane.b32.xlu0 %v3915_v10, 256  ;;  %v1614_v56 = vcombine.high %v3884_v9, %v3884_v9  ;;  %v1581_v9 = vrot.slane %v1567_v26, %v3797_v4 }
 0x33b   : > { %v1939_v12 = vsel %vm693_vm8, %v1747_v49, %v1907_v41  ;;  %v1938_v23 = vsel %vm693_vm8, %v1746_v40, %v1906_v61  ;;  %v3292_v61 = vpop.eup %3291  ;;  %v1339_v40 = vmul.f32 1.442695, %v1299_v57 }
 0x33c   : > { %v1417_v15 = vpop.permute.xlu0 %1416  ;;  %v1410_v8 = vpop.permute.xlu1 %1409  ;;  %v3929_v0 = vadd.f32 %v2331_v18, %v1939_v12  ;;  %v3931_v60 = vadd.f32 %v2306_v32, %v1938_v23  ;;  %v921_v32 = vmul.f32 %v3877_v2, %v920_v14  ;;  %v922_v23 = vand.u32 2147483647, %v3877_v2 }
 0x33d   : > { %v1749_v49 = vmul.f32 %v3927_v22, %v1417_v15  ;;  %v1748_v41 = vmul.f32 %v1672_v59, %v1410_v8  ;;  %v918_v8 = vmul.f32 0.6931472, %v3292_v61  ;;  %3297 = vpow2.f32 %v1339_v40  ;;  %v3294_v14 = vpop.eup %3293 }
 0x33e   : > { %1978 = vbcast.lane.b32.xlu1 %v3902_v44, 264  ;;  %2147 = vbcast.lane.b32.xlu0 %v3902_v44, 272  ;;  %v2332_v12 = vmul.f32 %v3288_v55, %v3931_v60  ;;  %v2357_v18 = vmul.f32 %v3290_v33, %v3929_v0  ;;  %v1300_v55 = vmul.f32 %v1230_v13, %v3845_v52  ;;  %3299 = vpow2.f32 %v1337_v51 }
 0x33f   : > { %v1301_v33 = vmul.f32 %v1234_v50, %v3830_v37  ;;  %v1680_v19 = vrot.slane %v1614_v56, %v3650_v27  ;;  %vm3957_vm11 = vcmp.lt.f32.partialorder %v922_v23, 0.0004427343  ;;  %v1994_v40 = vrot.slane %v3712_v1, %v3644_v24 }
 0x340   : > { %v1796_v57 = vpop.permute.xlu0 %1795  ;;  %v1792_v15 = vpop.permute.xlu1 %1791  ;;  %v1238_v51 = vrot.slane %v1159_v58, %v3650_v27  ;;  %v1341_v56 = vmul.f32 1.442695, %v1300_v55  ;;  %v1161_v58 = vcombine.high %v3918_v21, %v3918_v21 }
 0x341   : > { %v1909_v6 = vmul.f32 %v1796_v57, %v3927_v22  ;;  %v1908_v62 = vmul.f32 %v1792_v15, %v1672_v59 }
 0x342   : > { %1989 = vbcast.lane.b32.xlu1 %v3915_v10, 264  ;;  %2155 = vbcast.lane.b32.xlu0 %v3915_v10, 272  ;;  %3301 = vpow2.f32 %v1341_v56 }
 0x343   : > { %v1941_v2 = vsel %vm693_vm8, %v1749_v49, %v1909_v6  ;;  %v1940_v16 = vsel %vm693_vm8, %v1748_v41, %v1908_v62  ;;  %v3296_v6 = vpop.eup %3295  ;;  %v924_v62 = vsel %vm3957_vm11, %v921_v32, %v918_v8 }
 0x344   : > { %v1428_v13 = vpop.permute.xlu0 %1427  ;;  %v1421_v61 = vpop.permute.xlu1 %1420  ;;  %v3963_v26 = vadd.f32 %v2332_v12, %v1940_v16  ;;  %v3965_v57 = vadd.f32 %v2357_v18, %v1941_v2  ;;  %v1343_v12 = vmul.f32 1.442695, %v1301_v33  ;;  %v3975_v18 = vrot.slane %v1581_v9, %v3797_v4 }
 0x345   : > { %v1751_v49 = vmul.f32 %v1680_v19, %v1428_v13  ;;  %v1750_v41 = vmul.f32 %v3927_v22, %v1421_v61  ;;  %v3979_v8 = vsel %vm900_vm12, %v3818_v17, %v924_v62  ;;  %v1302_v2 = vmul.f32 %v1234_v50, %v3845_v52 }
 0x346   : > { %2151 = vbcast.lane.b32.xlu1 %v3902_v44, 280  ;;  %1996 = vbcast.lane.b32.xlu0 %v1994_v40, 256  ;;  %v2358_v23 = vmul.f32 %v3294_v14, %v3963_v26  ;;  %v2383_v24 = vmul.f32 %v3296_v6, %v3965_v57  ;;  %v1303_v33 = vmul.f32 %v1238_v51, %v3830_v37  ;;  %3303 = vpow2.f32 %v1343_v12 }
 0x347   : > { %v1583_v16 = vcombine.high %v1581_v9, %v1581_v9  ;;  %v1684_v59 = vrot.slane %v3975_v18, %v3650_v27  ;;  %v3298_v21 = vpop.eup %3297  ;;  %v2005_v50 = vrot.slane %v3712_v1, %v3647_v25  ;;  %v1169_v9 = vrot.slane %v3979_v8, %v3797_v4 }
 0x348   : > { %v1804_v32 = vpop.permute.xlu0 %1803  ;;  %v1800_v15 = vpop.permute.xlu1 %1799 }
 0x349   : > { %v1911_v44 = vmul.f32 %v1804_v32, %v1680_v19  ;;  %v1910_v55 = vmul.f32 %v1800_v15, %v3927_v22  ;;  %v4000_v56 = vrot.slane %v1583_v16, %v3797_v4 }
 0x34a   : > { %2159 = vbcast.lane.b32.xlu1 %v3915_v10, 280  ;;  %2163 = vbcast.lane.b32.xlu0 %v1994_v40, 272  ;;  %v3300_v10 = vpop.eup %3299 }
 0x34b   : > { %v1943_v14 = vsel %vm693_vm8, %v1751_v49, %v1911_v44  ;;  %v1942_v17 = vsel %vm693_vm8, %v1750_v41, %v1910_v55  ;;  %v1345_v41 = vmul.f32 1.442695, %v1302_v2  ;;  %v4006_v44 = vrot.slane %v1169_v9, %v3797_v4 }
 0x34c   : > { %v1439_v13 = vpop.permute.xlu0 %1438  ;;  %v1432_v22 = vpop.permute.xlu1 %1431  ;;  %v3993_v61 = vadd.f32 %v2358_v23, %v1942_v17  ;;  %v3995_v6 = vadd.f32 %v2383_v24, %v1943_v14  ;;  %v1242_v23 = vrot.slane %v1161_v58, %v3650_v27  ;;  %v1347_v24 = vmul.f32 1.442695, %v1303_v33 }
 0x34d   : > { %v1753_v62 = vmul.f32 %v1684_v59, %v1439_v13  ;;  %v1752_v49 = vmul.f32 %v1680_v19, %v1432_v22  ;;  %v1304_v2 = vmul.f32 %v1238_v51, %v3845_v52  ;;  %v1688_v16 = vrot.slane %v4000_v56, %v3650_v27 }
 0x34e   : > { %2000 = vbcast.lane.b32.xlu1 %v1994_v40, 264  ;;  %2007 = vbcast.lane.b32.xlu0 %v2005_v50, 256  ;;  %v2384_v12 = vmul.f32 %v3300_v10, %v3993_v61  ;;  %v2409_v25 = vmul.f32 %v3298_v21, %v3995_v6  ;;  %3305 = vpow2.f32 %v1345_v41  ;;  %v1305_v33 = vmul.f32 %v1242_v23, %v3830_v37  ;;  %v3302_v21 = vpop.eup %3301 }
 0x34f   : > { %3307 = vpow2.f32 %v1347_v24  ;;  %v1349_v24 = vmul.f32 1.442695, %v1304_v2 }
 0x350   : > { %v1812_v32 = vpop.permute.xlu0 %1811  ;;  %v1808_v15 = vpop.permute.xlu1 %1807 }
 0x351   : > { %v1913_v55 = vmul.f32 %v1812_v32, %v1684_v59  ;;  %v1912_v14 = vmul.f32 %v1808_v15, %v1680_v19  ;;  %v2016_v19 = vrot.slane %v3712_v1, %v3708_v63  ;;  %v3304_v10 = vpop.eup %3303  ;;  %v1177_v32 = vcombine.high %v1169_v9, %v1169_v9 }
 0x352   : > { %2167 = vbcast.lane.b32.xlu1 %v1994_v40, 280  ;;  %2171 = vbcast.lane.b32.xlu0 %v2005_v50, 272  ;;  %v1613_v15 = vcombine.high %v3975_v18, %v3975_v18  ;;  %3309 = vpow2.f32 %v1349_v24  ;;  %v4044_v24 = vmul.f32 %v3979_v8, %v3678_v36 }
 0x353   : > { %v1945_v17 = vsel %vm693_vm8, %v1753_v62, %v1913_v55  ;;  %v1944_v58 = vsel %vm693_vm8, %v1752_v49, %v1912_v14  ;;  %v1246_v62 = vrot.slane %v4006_v44, %v3650_v27 }
 0x354   : > { %v1450_v13 = vpop.permute.xlu0 %1449  ;;  %v1443_v22 = vpop.permute.xlu1 %1442  ;;  %v4016_v51 = vadd.f32 %v2384_v12, %v1944_v58  ;;  %v4018_v40 = vadd.f32 %v2409_v25, %v1945_v17  ;;  %v1351_v12 = vmul.f32 1.442695, %v1305_v33  ;;  %v4027_v58 = vrot.slane %v1177_v32, %v3797_v4 }
 0x355   : > { %v1755_v41 = vmul.f32 %v1688_v16, %v1450_v13  ;;  %v1754_v49 = vmul.f32 %v1684_v59, %v1443_v22  ;;  %v4030_v2 = vrot.slane %v1613_v15, %v3650_v27  ;;  %v1307_v13 = vmul.f32 %v1246_v62, %v3830_v37 }
 0x356   : > { %2011 = vbcast.lane.b32.xlu1 %v2005_v50, 264  ;;  %2018 = vbcast.lane.b32.xlu0 %v2016_v19, 256  ;;  %v2410_v55 = vmul.f32 %v3302_v21, %v4016_v51  ;;  %v2435_v63 = vmul.f32 %v3304_v10, %v4018_v40  ;;  %3311 = vpow2.f32 %v1351_v12  ;;  %v1306_v33 = vmul.f32 %v1242_v23, %v3845_v52 }
 0x357   : > { %v1250_v23 = vrot.slane %v4027_v58, %v3650_v27  ;;  %v1355_v12 = vmul.f32 1.442695, %v1307_v13 }
 0x358   : > { %v1820_v25 = vpop.permute.xlu0 %1819  ;;  %v1816_v14 = vpop.permute.xlu1 %1815 }
 0x359   : > { %v1915_v17 = vmul.f32 %v1820_v25, %v1688_v16  ;;  %v1914_v9 = vmul.f32 %v1816_v14, %v1684_v59  ;;  %v3306_v22 = vpop.eup %3305  ;;  %v1353_v14 = vmul.f32 1.442695, %v1306_v33  ;;  %v1309_v13 = vmul.f32 %v1250_v23, %v3830_v37 }
 0x35a   : > { %2175 = vbcast.lane.b32.xlu1 %v2005_v50, 280  ;;  %2179 = vbcast.lane.b32.xlu0 %v2016_v19, 272  ;;  %v2027_v50 = vrot.slane %v3712_v1, %v3716_v3  ;;  %v3308_v25 = vpop.eup %3307  ;;  %3313 = vpow2.f32 %v1355_v12 }
 0x35b   : > { %v1947_v18 = vsel %vm693_vm8, %v1755_v41, %v1915_v17  ;;  %v1946_v21 = vsel %vm693_vm8, %v1754_v49, %v1914_v9  ;;  %3315 = vpow2.f32 %v1353_v14  ;;  %v1359_v14 = vmul.f32 1.442695, %v1309_v13 }
 0x35c   : > { %v1461_v59 = vpop.permute.xlu0 %1460  ;;  %v1454_v10 = vpop.permute.xlu1 %1453  ;;  %v4038_v32 = vadd.f32 %v2410_v55, %v1946_v21  ;;  %v4040_v15 = vadd.f32 %v2435_v63, %v1947_v18  ;;  %v1615_v63 = vcombine.high %v4000_v56, %v4000_v56  ;;  %v1623_v18 = vrot.slane %v4044_v24, %v3797_v4 }
 0x35d   : > { %v1757_v41 = vmul.f32 %v4030_v2, %v1461_v59  ;;  %v1756_v49 = vmul.f32 %v1688_v16, %v1454_v10  ;;  %v1207_v10 = vcombine.high %v4006_v44, %v4006_v44  ;;  %v3310_v36 = vpop.eup %3309  ;;  %v2038_v44 = vrot.slane %v3712_v1, %v3720_v5 }
 0x35e   : > { %4444 = vst [vmem:[#allocation25_spill] sm:$0xff] %v4040_v15  ;;  %2022 = vbcast.lane.b32.xlu1 %v2016_v19, 264  ;;  %2029 = vbcast.lane.b32.xlu0 %v2027_v50, 256  ;;  %v2436_v3 = vmul.f32 %v3306_v22, %v4038_v32  ;;  %v2461_v55 = vmul.f32 %v3308_v25, %v4040_v15  ;;  %3317 = vpow2.f32 %v1359_v14 }
 0x35f   : > { %v1308_v22 = vmul.f32 %v1246_v62, %v3845_v52  ;;  %v1696_v25 = vrot.slane %v1615_v63, %v3650_v27  ;;  %v1631_v15 = vcombine.high %v1623_v18, %v1623_v18  ;;  %v4070_v62 = vrot.slane %v1623_v18, %v3797_v4 }
 0x360   : > { %v1828_v17 = vpop.permute.xlu0 %1827  ;;  %v1824_v9 = vpop.permute.xlu1 %1823  ;;  %v1254_v63 = vrot.slane %v1207_v10, %v3650_v27  ;;  %v1310_v18 = vmul.f32 %v1250_v23, %v3845_v52  ;;  %v1209_v13 = vcombine.high %v4027_v58, %v4027_v58  ;;  %v4093_v58 = vrot.slane %v3712_v1, %v3724_v7 }
 0x361   : > { %v1917_v21 = vmul.f32 %v1828_v17, %v4030_v2  ;;  %v1916_v59 = vmul.f32 %v1824_v9, %v1688_v16  ;;  %v3312_v12 = vpop.eup %3311 }
 0x362   : > { %2183 = vbcast.lane.b32.xlu1 %v2016_v19, 280  ;;  %2187 = vbcast.lane.b32.xlu0 %v2027_v50, 272 }
 0x363   : > { %v1949_v56 = vsel %vm693_vm8, %v1757_v41, %v1917_v21  ;;  %v1948_v33 = vsel %vm693_vm8, %v1756_v49, %v1916_v59 }
 0x364   : > { %v1472_v17 = vpop.permute.xlu0 %1471  ;;  %v1465_v16 = vpop.permute.xlu1 %1464  ;;  %v4065_v9 = vadd.f32 %v2436_v3, %v1948_v33  ;;  %v4067_v19 = vadd.f32 %v2461_v55, %v1949_v56  ;;  %v1357_v3 = vmul.f32 1.442695, %v1308_v22  ;;  %v1162_v55 = vcombine.high %v3979_v8, %v3979_v8 }
 0x365   : > { %v1759_v41 = vmul.f32 %v1696_v25, %v1472_v17  ;;  %v1758_v49 = vmul.f32 %v4030_v2, %v1465_v16  ;;  %v1700_v33 = vrot.slane %v4070_v62, %v3650_v27  ;;  %v4086_v22 = vrot.slane %v1631_v15, %v3797_v4 }
 0x366   : > { %2033 = vbcast.lane.b32.xlu1 %v2027_v50, 264  ;;  %2040 = vbcast.lane.b32.xlu0 %v2038_v44, 256  ;;  %v2462_v21 = vmul.f32 %v3310_v36, %v4065_v9  ;;  %v2487_v5 = vmul.f32 %v3312_v12, %v4067_v19  ;;  %v1311_v36 = vmul.f32 %v1254_v63, %v3830_v37  ;;  %3319 = vpow2.f32 %v1357_v3  ;;  %v3314_v12 = vpop.eup %3313 }
 0x367   : > { %v1921_v8 = vmul.f32 %v3758_v31, %v1700_v33  ;;  %v1361_v31 = vmul.f32 1.442695, %v1310_v18  ;;  %v1704_v7 = vrot.slane %v4086_v22, %v3650_v27 }
 0x368   : > { %v1836_v59 = vpop.permute.xlu0 %1835  ;;  %v1832_v56 = vpop.permute.xlu1 %1831  ;;  %v1363_v3 = vmul.f32 1.442695, %v1311_v36  ;;  %v1312_v36 = vmul.f32 %v1254_v63, %v3845_v52 }
 0x369   : > { %v1919_v17 = vmul.f32 %v1836_v59, %v1696_v25  ;;  %v1918_v10 = vmul.f32 %v1832_v56, %v4030_v2  ;;  %v1176_v56 = vrot.slane %v1162_v55, %v3797_v4  ;;  %v2307_v55 = vmul.f32 0.0, %v3314_v12 }
 0x36a   : > { %2191 = vbcast.lane.b32.xlu1 %v2027_v50, 280  ;;  %2195 = vbcast.lane.b32.xlu0 %v2038_v44, 272  ;;  %v3316_v50 = vpop.eup %3315  ;;  %3321 = vpow2.f32 %v1361_v31  ;;  %v1763_v12 = vmul.f32 %v1704_v7, %v3764_v35 }
 0x36b   : > { %v1951_v23 = vsel %vm693_vm8, %v1759_v41, %v1919_v17  ;;  %v1950_v16 = vsel %vm693_vm8, %v1758_v49, %v1918_v10  ;;  %v1761_v41 = vmul.f32 %v1700_v33, %v3754_v29  ;;  %v1258_v49 = vrot.slane %v1209_v13, %v3650_v27 }
 0x36c   : > { %v1476_v2 = vpop.permute.xlu1 %1475  ;;  %v2063_v59 = vpop.permute.xlu0 %2062  ;;  %v4095_v14 = vadd.f32 %v2462_v21, %v1950_v16  ;;  %v4097_v15 = vadd.f32 %v2487_v5, %v1951_v23  ;;  %v4108_v18 = vrot.slane %v1176_v56, %v3797_v4  ;;  %v1923_v29 = vmul.f32 %v3768_v39, %v1704_v7 }
 0x36d   : > { %v1760_v17 = vmul.f32 %v1696_v25, %v1476_v2  ;;  %v1953_v21 = vsel %vm693_vm8, %v1761_v41, %v1921_v8  ;;  %v1313_v23 = vmul.f32 %v1258_v49, %v3830_v37  ;;  %3323 = vpow2.f32 %v1363_v3  ;;  %v3318_v39 = vpop.eup %3317 }
 0x36e   : > { %2044 = vbcast.lane.b32.xlu1 %v2038_v44, 264  ;;  %2051 = vbcast.lane.b32.xlu0 %v4093_v58, 256  ;;  %v2488_v1 = vmul.f32 %v3316_v50, %v4095_v14  ;;  %v2311_v16 = vadd.f32 %v2307_v55, %v1953_v21  ;;  %v1922_v8 = vmul.f32 %v3756_v30, %v1700_v33 }
 0x36f   : > { %v1661_v2 = vcombine.high %v4070_v62, %v4070_v62  ;;  %v1955_v30 = vsel %vm693_vm8, %v1763_v12, %v1923_v29  ;;  %v1262_v35 = vrot.slane %v4108_v18, %v3650_v27  ;;  %v1208_v55 = vcombine.high %v4108_v18, %v4108_v18 }
 0x370   : > { %v1840_v5 = vpop.permute.xlu1 %1839  ;;  %v2074_v10 = vpop.permute.xlu0 %2073 }
 0x371   : > { %v1920_v13 = vmul.f32 %v1840_v5, %v1696_v25  ;;  %v1178_v25 = vcombine.high %v1176_v56, %v1176_v56  ;;  %v3320_v3 = vpop.eup %3319  ;;  %v1365_v5 = vmul.f32 1.442695, %v1312_v36  ;;  %v2333_v56 = vmul.f32 %v3318_v39, %v2311_v16 }
 0x372   : > { %2199 = vbcast.lane.b32.xlu1 %v2038_v44, 280  ;;  %2203 = vbcast.lane.b32.xlu0 %v4093_v58, 272  ;;  %v1762_v44 = vmul.f32 %v1700_v33, %v3752_v28  ;;  %v1708_v28 = vrot.slane %v1661_v2, %v3650_v27  ;;  %v2308_v12 = vmul.f32 0.0, %v3320_v3 }
 0x373   : > { %v1952_v50 = vsel %vm693_vm8, %v1760_v17, %v1920_v13  ;;  %v1367_v17 = vmul.f32 1.442695, %v1313_v23  ;;  %v2337_v13 = vadd.f32 %v2333_v56, %v1955_v30  ;;  %v1924_v23 = vmul.f32 %v3766_v38, %v1704_v7 }
 0x374   : > { %v2067_v31 = vpop.permute.xlu1 %2066  ;;  %v2212_v63 = vpop.permute.xlu0 %2211  ;;  %v4119_v41 = vadd.f32 %v2488_v1, %v1952_v50  ;;  %v1616_v1 = vcombine.high %v4044_v24, %v4044_v24  ;;  %v1954_v33 = vsel %vm693_vm8, %v1762_v44, %v1922_v8  ;;  %v1925_v24 = vmul.f32 %v3780_v46, %v1708_v28 }
 0x375   : > { %v2289_v21 = vsel %vm693_vm8, %v2063_v59, %v2212_v63  ;;  %v4133_v59 = vrot.slane %v1178_v25, %v3797_v4  ;;  %v1315_v8 = vmul.f32 %v1262_v35, %v3830_v37  ;;  %3325 = vpow2.f32 %v1365_v5  ;;  %v3322_v18 = vpop.eup %3321 }
 0x376   : > { %v2315_v62 = vmul.f32 %v2311_v16, %v2289_v21  ;;  %2055 = vbcast.lane.b32.xlu1 %v4093_v58, 264  ;;  %2267 = vbcast.lane.b32.xlu0 %v3889_v47, 272  ;;  %v1314_v16 = vmul.f32 %v1258_v49, %v3845_v52  ;;  %v2312_v39 = vadd.f32 %v2308_v12, %v1954_v33  ;;  %3327 = vpow2.f32 %v1367_v17 }
 0x377   : > { %v1764_v25 = vmul.f32 %v1704_v7, %v3762_v34  ;;  %v1765_v63 = vmul.f32 %v1708_v28, %v3774_v43  ;;  %v1663_v49 = vcombine.high %v4086_v22, %v4086_v22  ;;  %v3324_v38 = vpop.eup %3323  ;;  %v4148_v46 = vrot.slane %v1616_v1, %v3797_v4 }
 0x378   : > { %v2078_v29 = vpop.permute.xlu1 %2077  ;;  %v2220_v36 = vpop.permute.xlu0 %2219  ;;  %v1369_v44 = vmul.f32 1.442695, %v1314_v16  ;;  %v1266_v34 = vrot.slane %v4133_v59, %v3650_v27  ;;  %v2334_v22 = vmul.f32 %v3322_v18, %v2312_v39  ;;  %v2359_v7 = vmul.f32 %v3324_v38, %v2337_v13 }
 0x379   : > { %v2291_v2 = vsel %vm693_vm8, %v2074_v10, %v2220_v36  ;;  %v1957_v30 = vsel %vm693_vm8, %v1765_v63, %v1925_v24  ;;  %v4157_v5 = vrot.slane %v1208_v55, %v3650_v27  ;;  %v1316_v56 = vmul.f32 %v1262_v35, %v3845_v52 }
 0x37a   : > { %v2341_v50 = vmul.f32 %v2337_v13, %v2291_v2  ;;  %2207 = vbcast.lane.b32.xlu1 %v4093_v58, 280  ;;  %v1956_v58 = vsel %vm693_vm8, %v1764_v25, %v1924_v23  ;;  %v1371_v17 = vmul.f32 1.442695, %v1315_v8  ;;  %v1926_v1 = vmul.f32 %v3778_v45, %v1708_v28 }
 0x37b   : > { %v2338_v36 = vadd.f32 %v2334_v22, %v1956_v58  ;;  %v2363_v16 = vadd.f32 %v2359_v7, %v1957_v30  ;;  %3329 = vpow2.f32 %v1369_v44  ;;  %v1766_v55 = vmul.f32 %v1708_v28, %v3772_v42 }
 0x37c   : > { %v2216_v10 = vpop.permute.xlu1 %2215  ;;  %v2085_v3 = vpop.permute.xlu0 %2084  ;;  %3331 = vpow2.f32 %v1371_v17  ;;  %v1373_v28 = vmul.f32 1.442695, %v1316_v56  ;;  %v1632_v38 = vcombine.high %v4148_v46, %v4148_v46 }
 0x37d   : > { %v2290_v21 = vsel %vm693_vm8, %v2067_v31, %v2216_v10  ;;  %v1712_v31 = vrot.slane %v1663_v49, %v3650_v27  ;;  %v1958_v49 = vsel %vm693_vm8, %v1766_v55, %v1926_v1 }
 0x37e   : > { %v2316_v43 = vmul.f32 %v2312_v39, %v2290_v21  ;;  %2271 = vbcast.lane.b32.xlu1 %v3889_v47, 280  ;;  %v1317_v39 = vmul.f32 %v1266_v34, %v3830_v37  ;;  %3333 = vpow2.f32 %v1373_v28 }
 0x37f   : > { %v1927_v24 = vmul.f32 %v3788_v54, %v1712_v31  ;;  %v1767_v45 = vmul.f32 %v1712_v31, %v3784_v48  ;;  %v3326_v54 = vpop.eup %3325  ;;  %v1318_v48 = vmul.f32 %v1266_v34, %v3845_v52  ;;  %v1928_v7 = vmul.f32 %v3786_v53, %v1712_v31  ;;  %v4445_v53 = vld [vmem:[#allocation10_spill] sm:$0xff] }
 0x380   : > { %v2324_v33 = vadd.f32 %v2316_v43, %v2315_v62  ;;  %v2224_v12 = vpop.permute.xlu1 %2223  ;;  %v2228_v23 = vpop.permute.xlu0 %2227  ;;  %v4170_v62 = vrot.slane %v4148_v46, %v3797_v4  ;;  %v2360_v10 = vmul.f32 %v3326_v54, %v2338_v36  ;;  %v1375_v30 = vmul.f32 1.442695, %v1317_v39 }
 0x381   : > { %v2292_v47 = vsel %vm693_vm8, %v2078_v29, %v2224_v12  ;;  %v2293_v13 = vsel %vm693_vm8, %v2085_v3, %v2228_v23  ;;  %v3328_v42 = vpop.eup %3327  ;;  %v1959_v3 = vsel %vm693_vm8, %v1767_v45, %v1927_v24 }
 0x382   : > { %v2325_v35 = vrot.slane %v2324_v33, 4  ;;  %v2342_v2 = vmul.f32 %v2338_v36, %v2292_v47  ;;  %v2367_v8 = vmul.f32 %v2363_v16, %v2293_v13  ;;  %v2385_v58 = vmul.f32 %v3328_v42, %v2363_v16 }
 0x383   : > { %v1716_v43 = vrot.slane %v4170_v62, %v3650_v27  ;;  %v2364_v22 = vadd.f32 %v2360_v10, %v1958_v49  ;;  %v1377_v13 = vmul.f32 1.442695, %v1318_v48  ;;  %3335 = vpow2.f32 %v1375_v30 }
 0x384   : > { %v2326_v18 = vadd.f32 %v2325_v35, %v2324_v33  ;;  %v2350_v29 = vadd.f32 %v2342_v2, %v2341_v50  ;;  %v2089_v25 = vpop.permute.xlu1 %2088  ;;  %v2096_v63 = vpop.permute.xlu0 %2095  ;;  %v1319_v50 = vmul.f32 %v4157_v5, %v3830_v37  ;;  %v2389_v1 = vadd.f32 %v2385_v58, %v1959_v3  ;;  %v4446_v58 = vld [vmem:[#allocation11_spill] sm:$0xff] }
 0x385   : > { %v1929_v34 = vmul.f32 %v3805_v11, %v1716_v43  ;;  %v1768_v37 = vmul.f32 %v1712_v31, %v3782_v20  ;;  %v3330_v47 = vpop.eup %3329  ;;  %v1769_v55 = vmul.f32 %v1716_v43, %v4445_v53  ;;  %v4188_v35 = vrot.slane %v1632_v38, %v3797_v4  ;;  %v2592_v53 = vld [vmem:[%s4209_s30] sm:$0xff] }
 0x386   : > { %v2327_v44 = vrot.slane %v2326_v18, 2  ;;  %v2351_v21 = vrot.slane %v2350_v29, 4  ;;  %v2386_v20 = vmul.f32 %v3330_v47, %v2364_v22  ;;  %v1379_v4 = vmul.f32 1.442695, %v1319_v50 }
 0x387   : > { %v1961_v31 = vsel %vm693_vm8, %v1769_v55, %v1929_v34  ;;  %v1720_v28 = vrot.slane %v4188_v35, %v3650_v27  ;;  %3337 = vpow2.f32 %v1377_v13  ;;  %v1930_v30 = vmul.f32 %v4446_v58, %v1716_v43  ;;  %v2593_v55 = vld [vmem:[%s4209_s30 + $0x8] sm:$0xff] }
 0x388   : > { %v2328_v56 = vadd.f32 %v2327_v44, %v2326_v18  ;;  %v2352_v46 = vadd.f32 %v2351_v21, %v2350_v29  ;;  %v2232_v17 = vpop.permute.xlu1 %2231  ;;  %v2236_v33 = vpop.permute.xlu0 %2235  ;;  %v1960_v18 = vsel %vm693_vm8, %v1768_v37, %v1928_v7  ;;  %v1662_v37 = vcombine.high %v4170_v62, %v4170_v62 }
 0x389   : > { %v2294_v36 = vsel %vm693_vm8, %v2089_v25, %v2232_v17  ;;  %v2295_v12 = vsel %vm693_vm8, %v2096_v63, %v2236_v33  ;;  %v3332_v29 = vpop.eup %3331  ;;  %v1320_v25 = vmul.f32 %v4157_v5, %v3845_v52  ;;  %v2390_v38 = vadd.f32 %v2386_v20, %v1960_v18  ;;  %v4448_v33 = vld [vmem:[#allocation9_spill] sm:$0xff] }
 0x38a   : > { %v2353_v16 = vrot.slane %v2352_v46, 2  ;;  %v2368_v23 = vmul.f32 %v2364_v22, %v2294_v36  ;;  %v2393_v24 = vmul.f32 %v2389_v1, %v2295_v12  ;;  %v2329_v2 = vrot.slane %v2328_v56, 1  ;;  %v4447_v22 = vld [vmem:[#allocation15_spill] sm:$0xff]  ;;  %v4449_v36 = vld [vmem:[#allocation13_spill] sm:$0xff] }
 0x38b   : > { %v2411_v42 = vmul.f32 %v3332_v29, %v2389_v1  ;;  %v1931_v52 = vmul.f32 %v4447_v22, %v1720_v28  ;;  %v1770_v34 = vmul.f32 %v1716_v43, %v4448_v33  ;;  %v1771_v12 = vmul.f32 %v1720_v28, %v4449_v36 }
 0x38c   : > { %v2354_v39 = vadd.f32 %v2353_v16, %v2352_v46  ;;  %v2376_v11 = vadd.f32 %v2368_v23, %v2367_v8  ;;  %v2100_v45 = vpop.permute.xlu1 %2099  ;;  %v2107_v54 = vpop.permute.xlu0 %2106  ;;  %v2330_v8 = vadd.f32 %v2329_v2, %v2328_v56  ;;  %3339 = vpow2.f32 %v1379_v4 }
 0x38d   : > { %v2415_v44 = vadd.f32 %v2411_v42, %v1961_v31  ;;  %v3334_v56 = vpop.eup %3333  ;;  %v1962_v2 = vsel %vm693_vm8, %v1770_v34, %v1930_v30  ;;  %v3208_v62 = vpack.c.bf16 %v2593_v55, %v2592_v53  ;;  %v1381_v29 = vmul.f32 1.442695, %v1320_v25 }
 0x38e   : > { %v2355_v63 = vrot.slane %v2354_v39, 1  ;;  %v2377_v49 = vrot.slane %v2376_v11, 4  ;;  %v3336_v43 = vpop.eup %3335  ;;  %v1724_v20 = vrot.slane %v1662_v37, %v3650_v27 }
 0x38f   : > { %v2437_v18 = vmul.f32 %v3336_v43, %v2415_v44  ;;  %3209 = vmatprep.subr.bf16.mxu0 %v3208_v62  ;;  %3341 = vpow2.f32 %v1381_v29 }
 0x390   : > { %v2356_v10 = vadd.f32 %v2355_v63, %v2354_v39  ;;  %v2378_v3 = vadd.f32 %v2377_v49, %v2376_v11  ;;  %v2240_v48 = vpop.permute.xlu1 %2239  ;;  %v2244_v21 = vpop.permute.xlu0 %2243  ;;  %v1963_v39 = vsel %vm693_vm8, %v1771_v12, %v1931_v52  ;;  %3211 = vmatpush3.bf16.msra.mxu0 %v3208_v62  ;;  %v4452_v52 = vld [vmem:[#allocation12_spill] sm:$0xff] }
 0x391   : > { %v2296_v5 = vsel %vm693_vm8, %v2100_v45, %v2240_v48  ;;  %v2297_v50 = vsel %vm693_vm8, %v2107_v54, %v2244_v21  ;;  %v2412_v54 = vmul.f32 %v3334_v56, %v2390_v38  ;;  %v2441_v42 = vadd.f32 %v2437_v18, %v1963_v39  ;;  %v4451_v48 = vld [vmem:[#allocation19_spill] sm:$0xff]  ;;  %v4454_v39 = vld [vmem:[#allocation18_spill] sm:$0xff] }
 0x392   : > { %v2514_v7 = vsel %vm664_vm1, %v2330_v8, %v2356_v10  ;;  %v2379_v46 = vrot.slane %v2378_v3, 2  ;;  %v2394_v17 = vmul.f32 %v2390_v38, %v2296_v5  ;;  %v2419_v1 = vmul.f32 %v2415_v44, %v2297_v50  ;;  %v3338_v8 = vpop.eup %3337  ;;  %v4450_v10 = vld [vmem:[#allocation14_spill] sm:$0xff]  ;;  %v4453_v50 = vld [vmem:[#allocation17_spill] sm:$0xff] }
 0x393   : > { %v2416_v63 = vadd.f32 %v2412_v54, %v1962_v2  ;;  %v1933_v21 = vmul.f32 %v4451_v48, %v1724_v20  ;;  %v1772_v5 = vmul.f32 %v1720_v28, %v4452_v52 }
 0x394   : > { %v2380_v16 = vadd.f32 %v2379_v46, %v2378_v3  ;;  %v2402_v23 = vadd.f32 %v2394_v17, %v2393_v24  ;;  %v2111_v47 = vpop.permute.xlu1 %2110  ;;  %v2118_v13 = vpop.permute.xlu0 %2117  ;;  %v1932_v3 = vmul.f32 %v4450_v10, %v1720_v28  ;;  %v1773_v46 = vmul.f32 %v1724_v20, %v4453_v50 }
 0x396   : > { %v2381_v11 = vrot.slane %v2380_v16, 1  ;;  %v2403_v45 = vrot.slane %v2402_v23, 4  ;;  %v3340_v36 = vpop.eup %3339  ;;  %v1964_v12 = vsel %vm693_vm8, %v1772_v5, %v1932_v3  ;;  %v1965_v37 = vsel %vm693_vm8, %v1773_v46, %v1933_v21 }
 0x398   : > { %v2382_v31 = vadd.f32 %v2381_v11, %v2380_v16  ;;  %v2404_v24 = vadd.f32 %v2403_v45, %v2402_v23  ;;  %v2248_v49 = vpop.permute.xlu1 %2247  ;;  %v2252_v4 = vpop.permute.xlu0 %2251 }
 0x399   : > { %v2298_v58 = vsel %vm693_vm8, %v2111_v47, %v2248_v49  ;;  %v2299_v38 = vsel %vm693_vm8, %v2118_v13, %v2252_v4  ;;  %v2463_v47 = vmul.f32 %v3340_v36, %v2441_v42 }
 0x39a   : > { %v2516_v25 = vsel %vm667_vm2, %v2514_v7, %v2382_v31  ;;  %v2405_v44 = vrot.slane %v2404_v24, 2  ;;  %v2420_v30 = vmul.f32 %v2416_v63, %v2298_v58  ;;  %v2445_v22 = vmul.f32 %v2441_v42, %v2299_v38  ;;  %v4455_v31 = vld [vmem:[#allocation16_spill] sm:$0xff] }
 0x39b   : > { %v2438_v7 = vmul.f32 %v3338_v8, %v2416_v63  ;;  %v4225_v43 = vadd.f32 %v2463_v47, %v1965_v37  ;;  %v3342_v8 = vpop.eup %3341 }
 0x39c   : > { %v2406_v17 = vadd.f32 %v2405_v44, %v2404_v24  ;;  %v2428_v56 = vadd.f32 %v2420_v30, %v2419_v1  ;;  %v2122_v33 = vpop.permute.xlu1 %2121  ;;  %v2129_v34 = vpop.permute.xlu0 %2128  ;;  %v1934_v1 = vmul.f32 %v4454_v39, %v1724_v20  ;;  %v1774_v24 = vmul.f32 %v1724_v20, %v4455_v31 }
 0x39d   : > { %v2442_v55 = vadd.f32 %v2438_v7, %v1964_v12 }
 0x39e   : > { %v2407_v16 = vrot.slane %v2406_v17, 1  ;;  %v2429_v23 = vrot.slane %v2428_v56, 4  ;;  %v1966_v10 = vsel %vm693_vm8, %v1774_v24, %v1934_v1 }
 0x39f   : > { %v2464_v21 = vmul.f32 %v3342_v8, %v2442_v55 }
 0x3a0   : > { %v2408_v13 = vadd.f32 %v2407_v16, %v2406_v17  ;;  %v2430_v53 = vadd.f32 %v2429_v23, %v2428_v56  ;;  %v2256_v28 = vpop.permute.xlu1 %2255  ;;  %v2260_v2 = vpop.permute.xlu0 %2259 }
 0x3a1   : > { %v2300_v62 = vsel %vm693_vm8, %v2122_v33, %v2256_v28  ;;  %v2301_v11 = vsel %vm693_vm8, %v2129_v34, %v2260_v2 }
 0x3a2   : > { %v2518_v45 = vsel %vm670_vm3, %v2516_v25, %v2408_v13  ;;  %v2431_v54 = vrot.slane %v2430_v53, 2  ;;  %v2446_v18 = vmul.f32 %v2442_v55, %v2300_v62  ;;  %v2471_v29 = vmul.f32 %v4225_v43, %v2301_v11 }
 0x3a3   : > { %v4236_v25 = vadd.f32 %v2464_v21, %v1966_v10 }
 0x3a4   : > { %v2432_v63 = vadd.f32 %v2431_v54, %v2430_v53  ;;  %v2454_v49 = vadd.f32 %v2446_v18, %v2445_v22  ;;  %v2133_v42 = vpop.permute.xlu1 %2132  ;;  %v4233_v4 = vpop.permute.xlu0 %2139 }
 0x3a6   : > { %v2433_v3 = vrot.slane %v2432_v63, 1  ;;  %v2455_v48 = vrot.slane %v2454_v49, 4 }
 0x3a8   : > { %v2434_v58 = vadd.f32 %v2433_v3, %v2432_v63  ;;  %v2456_v38 = vadd.f32 %v2455_v48, %v2454_v49  ;;  %v2264_v44 = vpop.permute.xlu1 %2263  ;;  %v1975_v30 = vpop.permute.xlu0 %1974 }
 0x3a9   : > { %v2302_v52 = vsel %vm693_vm8, %v2133_v42, %v2264_v44 }
 0x3aa   : > { %v2520_v20 = vsel %vm673_vm4, %v2518_v45, %v2434_v58  ;;  %v2457_v22 = vrot.slane %v2456_v38, 2  ;;  %v2472_v5 = vmul.f32 %v4236_v25, %v2302_v52  ;;  %v4456_v45 = vld [vmem:[#allocation24_spill] sm:$0xff] }
 0x3ac   : > { %v2458_v50 = vadd.f32 %v2457_v22, %v2456_v38  ;;  %v2480_v46 = vadd.f32 %v2472_v5, %v2471_v29  ;;  %v4241_v17 = vpop.permute.xlu1 %2143  ;;  %v1986_v56 = vpop.permute.xlu0 %1985 }
 0x3ae   : > { %v2459_v33 = vrot.slane %v2458_v50, 1  ;;  %v2481_v34 = vrot.slane %v2480_v46, 4 }
 0x3b0   : > { %v2460_v36 = vadd.f32 %v2459_v33, %v2458_v50  ;;  %v2482_v12 = vadd.f32 %v2481_v34, %v2480_v46  ;;  %v1979_v37 = vpop.permute.xlu1 %1978  ;;  %v2148_v16 = vpop.permute.xlu0 %2147 }
 0x3b1   : > { %v2273_v28 = vsel %vm693_vm8, %v1975_v30, %v2148_v16 }
 0x3b2   : > { %v2522_v23 = vsel %vm676_vm5, %v2520_v20, %v2460_v36  ;;  %v2483_v7 = vrot.slane %v2482_v12, 2  ;;  %v2313_v54 = vmul.f32 %v4456_v45, %v2273_v28 }
 0x3b4   : > { %v2484_v47 = vadd.f32 %v2483_v7, %v2482_v12  ;;  %v1990_v13 = vpop.permute.xlu1 %1989  ;;  %v2156_v53 = vpop.permute.xlu0 %2155 }
 0x3b5   : > { %v2275_v29 = vsel %vm693_vm8, %v1986_v56, %v2156_v53 }
 0x3b6   : > { %v2485_v55 = vrot.slane %v2484_v47, 1  ;;  %v2339_v42 = vmul.f32 %v3929_v0, %v2275_v29 }
 0x3b8   : > { %v2486_v2 = vadd.f32 %v2485_v55, %v2484_v47  ;;  %v2152_v39 = vpop.permute.xlu1 %2151  ;;  %v1997_v1 = vpop.permute.xlu0 %1996 }
 0x3b9   : > { %v2274_v62 = vsel %vm693_vm8, %v1979_v37, %v2152_v39 }
 0x3ba   : > { %v4247_v11 = vsel %vm679_vm6, %v2522_v23, %v2486_v2  ;;  %v2314_v18 = vmul.f32 %v3931_v60, %v2274_v62 }
 0x3bc   : > { %v2317_v31 = vadd.f32 %v2314_v18, %v2313_v54  ;;  %v2160_v24 = vpop.permute.xlu1 %2159  ;;  %v2164_v63 = vpop.permute.xlu0 %2163  ;;  %v1210_v54 = vcombine.high %v4133_v59, %v4133_v59 }
 0x3bd   : > { %v2276_v49 = vsel %vm693_vm8, %v1990_v13, %v2160_v24  ;;  %v2277_v60 = vsel %vm693_vm8, %v1997_v1, %v2164_v63 }
 0x3be   : > { %v2318_v8 = vrot.slane %v2317_v31, 4  ;;  %v2340_v10 = vmul.f32 %v3963_v26, %v2276_v49  ;;  %v2365_v0 = vmul.f32 %v3965_v57, %v2277_v60 }
 0x3c0   : > { %v2319_v3 = vadd.f32 %v2318_v8, %v2317_v31  ;;  %v2343_v48 = vadd.f32 %v2340_v10, %v2339_v42  ;;  %v2001_v21 = vpop.permute.xlu1 %2000  ;;  %v2008_v58 = vpop.permute.xlu0 %2007  ;;  %v1274_v8 = vrot.slane %v1210_v54, %v3650_v27 }
 0x3c2   : > { %v2320_v38 = vrot.slane %v2319_v3, 2  ;;  %v2344_v44 = vrot.slane %v2343_v48, 4 }
 0x3c4   : > { %v2321_v30 = vadd.f32 %v2320_v38, %v2319_v3  ;;  %v2345_v52 = vadd.f32 %v2344_v44, %v2343_v48  ;;  %v2168_v20 = vpop.permute.xlu1 %2167  ;;  %v2172_v22 = vpop.permute.xlu0 %2171  ;;  %v3355_v44 = vld [vmem:[%s4410_s10] sm:$0xff] }
 0x3c5   : > { %v2278_v5 = vsel %vm693_vm8, %v2001_v21, %v2168_v20  ;;  %v2279_v16 = vsel %vm693_vm8, %v2008_v58, %v2172_v22  ;;  %v1321_v60 = vmul.f32 %v3355_v44, %v1274_v8 }
 0x3c6   : > { %v2346_v50 = vrot.slane %v2345_v52, 2  ;;  %v2366_v46 = vmul.f32 %v3993_v61, %v2278_v5  ;;  %v2322_v26 = vrot.slane %v2321_v30, 1  ;;  %v2391_v61 = vmul.f32 %v3995_v6, %v2279_v16 }
 0x3c8   : > { %v2347_v56 = vadd.f32 %v2346_v50, %v2345_v52  ;;  %v2369_v33 = vadd.f32 %v2366_v46, %v2365_v0  ;;  %v2012_v34 = vpop.permute.xlu1 %2011  ;;  %v2019_v36 = vpop.permute.xlu0 %2018  ;;  %v2323_v23 = vadd.f32 %v2322_v26, %v2321_v30  ;;  %v3356_v30 = vld [vmem:[%s4410_s10 + $0x8] sm:$0xff]  ;;  %v1383_v26 = vmul.f32 1.442695, %v1321_v60 }
 0x3c9   : > { %v1322_v52 = vmul.f32 %v3356_v30, %v1274_v8  ;;  %v4460_v8 = vld [vmem:[#allocation23_spill] sm:$0xff] }
 0x3ca   : > { %v2348_v12 = vrot.slane %v2347_v56, 1  ;;  %v2370_v37 = vrot.slane %v2369_v33, 4  ;;  %3343 = vpow2.f32 %v1383_v26 }
 0x3cc   : > { %v2349_v7 = vadd.f32 %v2348_v12, %v2347_v56  ;;  %v2371_v47 = vadd.f32 %v2370_v37, %v2369_v33  ;;  %v2176_v13 = vpop.permute.xlu1 %2175  ;;  %v2180_v53 = vpop.permute.xlu0 %2179  ;;  %v1385_v56 = vmul.f32 1.442695, %v1322_v52 }
 0x3cd   : > { %v2280_v55 = vsel %vm693_vm8, %v2012_v34, %v2176_v13  ;;  %v2281_v31 = vsel %vm693_vm8, %v2019_v36, %v2180_v53  ;;  %v4457_v36 = vld [vmem:[#allocation25_spill] sm:$0xff] }
 0x3ce   : > { %v2513_v57 = vsel %vm664_vm1, %v2323_v23, %v2349_v7  ;;  %v2372_v28 = vrot.slane %v2371_v47, 2  ;;  %v2392_v2 = vmul.f32 %v4016_v51, %v2280_v55  ;;  %v2417_v3 = vmul.f32 %v4018_v40, %v2281_v31 }
 0x3cf   : > { %3345 = vpow2.f32 %v1385_v56  ;;  %v1664_v55 = vcombine.high %v4188_v35, %v4188_v35 }
 0x3d0   : > { %v2373_v39 = vadd.f32 %v2372_v28, %v2371_v47  ;;  %v2395_v1 = vadd.f32 %v2392_v2, %v2391_v61  ;;  %v2023_v62 = vpop.permute.xlu1 %2022  ;;  %v2030_v45 = vpop.permute.xlu0 %2029 }
 0x3d2   : > { %v2374_v18 = vrot.slane %v2373_v39, 1  ;;  %v2396_v29 = vrot.slane %v2395_v1, 4 }
 0x3d4   : > { %v2375_v24 = vadd.f32 %v2374_v18, %v2373_v39  ;;  %v2397_v63 = vadd.f32 %v2396_v29, %v2395_v1  ;;  %v2184_v49 = vpop.permute.xlu1 %2183  ;;  %v2188_v42 = vpop.permute.xlu0 %2187  ;;  %v1728_v18 = vrot.slane %v1664_v55, %v3650_v27  ;;  %v4458_v29 = vld [vmem:[#allocation6_spill] sm:$0xff] }
 0x3d5   : > { %v2282_v6 = vsel %vm693_vm8, %v2023_v62, %v2184_v49  ;;  %v2283_v40 = vsel %vm693_vm8, %v2030_v45, %v2188_v42  ;;  %v2878_v31 = vmul.f32 -1.442695, %v4458_v29  ;;  %v4459_v49 = vld [vmem:[#allocation22_spill] sm:$0xff] }
 0x3d6   : > { %v2515_v51 = vsel %vm667_vm2, %v2513_v57, %v2375_v24  ;;  %v2398_v10 = vrot.slane %v2397_v63, 2  ;;  %v2418_v48 = vmul.f32 %v4038_v32, %v2282_v6  ;;  %v2443_v12 = vmul.f32 %v4457_v36, %v2283_v40 }
 0x3d7   : > { %v1936_v42 = vmul.f32 %v4459_v49, %v1728_v18  ;;  %v1935_v6 = vmul.f32 %v4460_v8, %v1728_v18  ;;  %3347 = vpow2.f32 %v2878_v31  ;;  %v2595_v31 = vld [vmem:[%s4209_s30 + $0x18] sm:$0xff] }
 0x3d8   : > { %v2399_v59 = vadd.f32 %v2398_v10, %v2397_v63  ;;  %v2421_v21 = vadd.f32 %v2418_v48, %v2417_v3  ;;  %v2034_v58 = vpop.permute.xlu1 %2033  ;;  %v2041_v38 = vpop.permute.xlu0 %2040  ;;  %v4461_v48 = vld [vmem:[#allocation5_spill] sm:$0xff] }
 0x3d9   : > { %v3344_v3 = vpop.eup %3343 }
 0x3da   : > { %v2400_v20 = vrot.slane %v2399_v59, 1  ;;  %v2422_v22 = vrot.slane %v2421_v21, 4  ;;  %v2489_v30 = vmul.f32 %v3344_v3, %v4225_v43 }
 0x3dc   : > { %v2401_v5 = vadd.f32 %v2400_v20, %v2399_v59  ;;  %v2423_v32 = vadd.f32 %v2422_v22, %v2421_v21  ;;  %v2192_v50 = vpop.permute.xlu1 %2191  ;;  %v2196_v0 = vpop.permute.xlu0 %2195  ;;  %v2879_v59 = vmul.f32 -1.442695, %v4461_v48 }
 0x3dd   : > { %v2284_v46 = vsel %vm693_vm8, %v2034_v58, %v2192_v50  ;;  %v2285_v57 = vsel %vm693_vm8, %v2041_v38, %v2196_v0  ;;  %v3346_v38 = vpop.eup %3345 }
 0x3de   : > { %v2517_v33 = vsel %vm670_vm3, %v2515_v51, %v2401_v5  ;;  %v2424_v34 = vrot.slane %v2423_v32, 2  ;;  %v2444_v37 = vmul.f32 %v4065_v9, %v2284_v46  ;;  %v2469_v62 = vmul.f32 %v4067_v19, %v2285_v57  ;;  %v4462_v19 = vld [vmem:[#allocation20_spill] sm:$0xff] }
 0x3df   : > { %v1776_v21 = vmul.f32 %v1728_v18, %v4462_v19  ;;  %3349 = vpow2.f32 %v2879_v59 }
 0x3e0   : > { %v2425_v16 = vadd.f32 %v2424_v34, %v2423_v32  ;;  %v2447_v23 = vadd.f32 %v2444_v37, %v2443_v12  ;;  %v2045_v7 = vpop.permute.xlu1 %2044  ;;  %v2052_v47 = vpop.permute.xlu0 %2051  ;;  %v2490_v32 = vmul.f32 %v3346_v38, %v4236_v25  ;;  %v2597_v38 = vld [vmem:[%s4209_s30 + $0x28] sm:$0xff] }
 0x3e1   : > { %v1968_v5 = vsel %vm693_vm8, %v1776_v21, %v1936_v42 }
 0x3e2   : > { %v2426_v13 = vrot.slane %v2425_v16, 1  ;;  %v2448_v53 = vrot.slane %v2447_v23, 4  ;;  %v2494_v36 = vadd.f32 %v2490_v32, %v1968_v5 }
 0x3e4   : > { %v2427_v28 = vadd.f32 %v2426_v13, %v2425_v16  ;;  %v2449_v61 = vadd.f32 %v2448_v53, %v2447_v23  ;;  %v2200_v2 = vpop.permute.xlu1 %2199  ;;  %v2204_v54 = vpop.permute.xlu0 %2203 }
 0x3e5   : > { %v2286_v39 = vsel %vm693_vm8, %v2045_v7, %v2200_v2  ;;  %v2287_v27 = vsel %vm693_vm8, %v2052_v47, %v2204_v54  ;;  %v3348_v13 = vpop.eup %3347 }
 0x3e6   : > { %v2519_v9 = vsel %vm673_vm4, %v2517_v33, %v2427_v28  ;;  %v2450_v1 = vrot.slane %v2449_v61, 2  ;;  %v2470_v45 = vmul.f32 %v4095_v14, %v2286_v39  ;;  %v4463_v14 = vld [vmem:[#allocation21_spill] sm:$0xff]  ;;  %v2495_v46 = vmul.f32 %v4097_v15, %v2287_v27 }
 0x3e7   : > { %v1775_v58 = vmul.f32 %v1728_v18, %v4463_v14  ;;  %v2884_v28 = vld [vmem:[%s543_s14] ss:$0 sm:$0xff]  ;;  %v2594_v18 = vld [vmem:[%s4209_s30 + $0x10] sm:$0xff] }
 0x3e8   : > { %v2451_v35 = vadd.f32 %v2450_v1, %v2449_v61  ;;  %v2473_v24 = vadd.f32 %v2470_v45, %v2469_v62  ;;  %v2056_v63 = vpop.permute.xlu1 %2055  ;;  %v2268_v52 = vpop.permute.xlu0 %2267  ;;  %v4464_v45 = vld [vmem:[#allocation7_spill] sm:$0xff]  ;;  %v2596_v27 = vld [vmem:[%s4209_s30 + $0x20] sm:$0xff] }
 0x3e9   : > { %v1967_v22 = vsel %vm693_vm8, %v1775_v58, %v1935_v6  ;;  %v2303_v43 = vsel %vm693_vm8, %v4233_v4, %v2268_v52  ;;  %v3350_v39 = vpop.eup %3349  ;;  %v2534_v54 = vmul.f32 %v2884_v28, %v4464_v45  ;;  %v4465_v6 = vld [vmem:[#allocation8_spill] sm:$0xff] }
 0x3ea   : > { %v2452_v51 = vrot.slane %v2451_v35, 1  ;;  %v2474_v10 = vrot.slane %v2473_v24, 4  ;;  %v2493_v33 = vadd.f32 %v2489_v30, %v1967_v22  ;;  %v639_v49 = vadd.f32 1.0, %v3350_v39 }
 0x3ec   : > { %v2453_v44 = vadd.f32 %v2452_v51, %v2451_v35  ;;  %v2475_v60 = vadd.f32 %v2474_v10, %v2473_v24  ;;  %v2208_v20 = vpop.permute.xlu1 %2207  ;;  %v2497_v16 = vmul.f32 %v2493_v33, %v2303_v43  ;;  %v2535_v51 = vmul.f32 %v2884_v28, %v4465_v6 }
 0x3ed   : > { %v2288_v40 = vsel %vm693_vm8, %v2056_v63, %v2208_v20  ;;  %v3212_v63 = vpack.c.bf16 %v2595_v31, %v2594_v18 }
 0x3ee   : > { %v2521_v50 = vsel %vm676_vm5, %v2519_v9, %v2453_v44  ;;  %v2476_v0 = vrot.slane %v2475_v60, 2  ;;  %v2496_v26 = vmul.f32 %v4119_v41, %v2288_v40  ;;  %v638_v9 = vadd.f32 1.0, %v3348_v13 }
 0x3ef   : > { %3213 = vmatprep.subr.bf16.mxu0 %v3212_v63 }
 0x3f0   : > { %v2477_v56 = vadd.f32 %v2476_v0, %v2475_v60  ;;  %v2499_v34 = vadd.f32 %v2496_v26, %v2495_v46  ;;  %v2272_v12 = vpop.permute.xlu1 %2271  ;;  %3351 = vrcp.f32 %v638_v9  ;;  %3215 = vmatpush3.bf16.msra.mxu0 %v3212_v63  ;;  %v3216_v60 = vpack.c.bf16 %v2597_v38, %v2596_v27  ;;  %v2599_v0 = vld [vmem:[%s4209_s30 + $0x38] sm:$0xff] }
 0x3f1   : > { %v2304_v25 = vsel %vm693_vm8, %v4241_v17, %v2272_v12  ;;  %3353 = vrcp.f32 %v639_v49 }
 0x3f2   : > { %v2478_v37 = vrot.slane %v2477_v56, 1  ;;  %v2500_v23 = vrot.slane %v2499_v34, 4  ;;  %v2498_v7 = vmul.f32 %v2494_v36, %v2304_v25  ;;  %3217 = vmatprep.subr.bf16.mxu0 %v3216_v60 }
 0x3f4   : > { %v2479_v15 = vadd.f32 %v2478_v37, %v2477_v56  ;;  %v2501_v47 = vadd.f32 %v2500_v23, %v2499_v34  ;;  %v2506_v41 = vadd.f32 %v2498_v7, %v2497_v16  ;;  %3219 = vmatpush3.bf16.msra.mxu0 %v3216_v60 }
 0x3f6   : > { %v2523_v4 = vsel %vm679_vm6, %v2521_v50, %v2479_v15  ;;  %v2502_v53 = vrot.slane %v2501_v47, 2  ;;  %v2507_v55 = vrot.slane %v2506_v41, 4  ;;  %v2598_v50 = vld [vmem:[%s4209_s30 + $0x30] sm:$0xff]  ;;  %s2862_s30 = sshll.u32 %s498_s29, 4 }
 0x3f7   : > { %v3220_v43 = vpack.c.bf16 %v2599_v0, %v2598_v50  ;;  %s500_s15 = scalar_lea.vmem [#allocation2], %s2862_s30  ;;  %s3361_s30 = sshll.u32 %s3423_s21, 4  ;;  %s3362_s30 = int_to_ptr.vmem [resolvable:$false] %s3361_s30 }
 0x3f8   : > { %v2503_v57 = vadd.f32 %v2502_v53, %v2501_v47  ;;  %v2508_v17 = vadd.f32 %v2507_v55, %v2506_v41  ;;  %s3363_s22 = scalar_lea.vmem %s3362_s30, 512 }
 0x3f9   : > { %3221 = vmatprep.subr.bf16.mxu0 %v3220_v43 }
 0x3fa   : > { %v2504_v61 = vrot.slane %v2503_v57, 1  ;;  %v2509_v2 = vrot.slane %v2508_v17, 2  ;;  %v3352_v56 = vpop.eup %3351  ;;  %3223 = vmatpush3.bf16.msra.mxu0 %v3220_v43 }
 0x3fb   : > { %v644_v37 = vmul.f32 %v3352_v56, %v4458_v29  ;;  %v3354_v16 = vpop.eup %3353 }
 0x3fc   : > { %v2505_v1 = vadd.f32 %v2504_v61, %v2503_v57  ;;  %v2510_v62 = vadd.f32 %v2509_v2, %v2508_v17  ;;  %v645_v7 = vmul.f32 %v3354_v16, %v4461_v48 }
 0x3fe   : > { %v2525_v35 = vsel %vm682_vm7, %v2523_v4, %v2505_v1  ;;  %v2511_v24 = vrot.slane %v2510_v62, 1 }
 0x3ff   : > { %v2536_v42 = vadd.f32 %v2534_v54, %v2525_v35 }
 0x400   : > { %v2512_v8 = vadd.f32 %v2511_v24, %v2510_v62 }
 0x401   : > { %v2540_v10 = vrot.slane %v2536_v42, 7  ;;  %v2544_v3 = vrot.slane %v2536_v42, 5  ;;  %v2548_v59 = vrot.slane %v2536_v42, 3  ;;  %v2552_v14 = vrot.slane %v2536_v42, 1 }
 0x402   : > { %v2526_v19 = vsel %vm682_vm7, %v4247_v11, %v2512_v8 }
 0x403   : > { %v2537_v21 = vadd.f32 %v2535_v51, %v2526_v19  ;;  %v2556_v58 = vsel %vm664_vm1, %v2540_v10, %v2544_v3 }
 0x404   : > { %v2558_v44 = vsel %vm667_vm2, %v2556_v58, %v2548_v59 }
 0x405   : > { %v2560_v30 = vsel %vm670_vm3, %v2558_v44, %v2552_v14  ;;  %v2541_v52 = vrot.slane %v2537_v21, 7  ;;  %v2545_v20 = vrot.slane %v2537_v21, 5  ;;  %v2549_v22 = vrot.slane %v2537_v21, 3 }
 0x406   : > { %v2562_v40 = vsel %vm673_vm4, %v2560_v30, %v2540_v10  ;;  %v2553_v5 = vrot.slane %v2537_v21, 1 }
 0x407   : > { %v2564_v11 = vsel %vm676_vm5, %v2562_v40, %v2544_v3  ;;  %v2557_v32 = vsel %vm664_vm1, %v2541_v52, %v2545_v20 }
 0x408   : > { %v2566_v46 = vsel %vm679_vm6, %v2564_v11, %v2548_v59  ;;  %v2559_v26 = vsel %vm667_vm2, %v2557_v32, %v2549_v22 }
 0x409   : > { %v2568_v33 = vsel %vm682_vm7, %v2566_v46, %v2552_v14  ;;  %v2561_v34 = vsel %vm670_vm3, %v2559_v26, %v2553_v5 }
 0x40a   : > { %2572 = vrot.lane.b32.xlu0 %v2568_v33, %s3421_s25  ;;  %v2563_v36 = vsel %vm673_vm4, %v2561_v34, %v2541_v52 }
 0x40b   : > { %v2565_v12 = vsel %vm676_vm5, %v2563_v36, %v2545_v20 }
 0x40c   : > { %v2567_v25 = vsel %vm679_vm6, %v2565_v12, %v2549_v22 }
 0x40d   : > { %v2569_v23 = vsel %vm682_vm7, %v2567_v25, %v2553_v5 }
 0x40e   : > { %2574 = vrot.lane.b32.xlu1 %v2569_v23, %s3421_s25  ;;  %2582 = vrot.lane.b32.xlu0 %v644_v37, %s3421_s25 }
 0x412   : > { %2584 = vrot.lane.b32.xlu1 %v645_v7, %s3421_s25  ;;  %s2697_s25 = sshll.u32 %s500_s15, 4  ;;  %s4350_s25 = int_to_ptr.vmem [resolvable:$true] %s2697_s25 }
 0x413   : > { %s3357_s14 = scalar_lea.vmem %s4350_s25, 256  ;;  %p3364_p0 = scmp.lt.s32.totalorder %s4350_s25, %s3362_s30 }
 0x414   : > { %p3358_p11 = scmp.ne.s32.totalorder %s4350_s25, %s3357_s14  ;;  %p3365_p1 = scmp.lt.s32.totalorder %s3363_s22, %s3357_s14 }
 0x416   : > { %p3359_p12 = pnand %p3358_p11, %p3524_p5  ;;  %p3366_p2 = por %p3365_p1, %p3364_p0 }
 0x418   : > { %p3360_p13 = pneg %p3359_p12 }
 0x41a   : > { %p3367_p3 = pnand %p3366_p2, %p3360_p13 }
 0x47c   : > { %v2573_v15 = vpop.permute.xlu0 %2572 }
 0x47d   : > { %v2578_v47 = vadd.f32 %v2573_v15, %v2536_v42 }
 0x480   : > { %v2575_v41 = vpop.permute.xlu1 %2574  ;;  %v2583_v13 = vpop.permute.xlu0 %2582 }
 0x481   : > { %v2588_v4 = vmul.f32 %v2583_v13, %v2578_v47  ;;  %v2579_v53 = vadd.f32 %v2575_v41, %v2537_v21 }
 0x483   : > { %v2590_v29 = vmul.f32 0.5, %v2588_v4 }
 0x484   : > { %v2585_v55 = vpop.permute.xlu1 %2584 }
 0x485   : > { %v2589_v57 = vmul.f32 %v2585_v55, %v2579_v53  ;;  %3101 = vmatprep.mubr.msk.f32.mxu0 %vm693_vm8, %v2590_v29 }
 0x487   : > { %v2591_v17 = vmul.f32 0.5, %v2589_v57 }
 0x489   : > { %3102 = vmatmul.mubr.msk.f32.vlgmr.msra.gmra.mrb[4].mxu0 %vm693_vm8, %v2591_v17 }
 0x55c   : > { %v3103_v48 = vpop.f32.mrb[4].mxu0 }
 0x55d   : > { %2682 = vst.msk [vmem:[%s500_s15 + $0x8] sm:$0xff] %vm550_vm0, %v3103_v48  ;;  %v2672_v28 = vpop.f32.mrb[5].mxu0 }
 0x55e   : > { %2681 = vst.msk [vmem:[%s500_s15] sm:$0xff] %vm550_vm0, %v2672_v28 }
 0x55f   : > { %3370 = shalt.err (!%p3367_p3)
}
 0x560   : > { %s3371_s29 = scalar_lea.hbm %s4355_s12, 256  ;;  %s3375_s24 = scalar_lea.hbm %s4411_s11, 512 }
 0x561   : > { %p3372_p4 = scmp.ne.s32.totalorder %s4355_s12, %s3371_s29  ;;  %p3376_p9 = scmp.lt.u32.totalorder %s4355_s12, %s4411_s11 }
 0x562   : > { %p3377_p10 = scmp.lt.u32.totalorder %s3375_s24, %s3371_s29  ;;  %p3379_p12 = scmp.lt.u32.totalorder %s3371_s29, %s4355_s12 }
 0x563   : > { %p3373_p7 = pnand %p3372_p4, %p3524_p5 }
 0x564   : > { %p3378_p11 = por %p3377_p10, %p3376_p9 }
 0x565   : > { %p3374_p8 = pneg %p3373_p7 }
 0x566   : > { %p3380_p13 = por %p3379_p12, %p3378_p11 }
 0x568   : > { %p3381_p0 = pnand %p3380_p13, %p3374_p8 }
 0x56a   : > { %3384 = shalt.err (!%p3381_p0)
}
 0x56b   : > { %s3424_s14 = smov 128   ;;  %s3425_s22 = smov 8  }
 0x56c   : > { %3224 = dma.vmem_to_hbm [thread:$0]  (%p3524_p5), %s4350_s25, 256, %s4355_s12, %s4359_s13, %s3424_s14, %s3424_s14, %s3425_s22  }
 0x56d PF: > { %p3230_p1 = scmp.ge.s32.totalorder %s3419_s20, 2  ;;  %s2712_s15 = sand.u32 1, %s3407_s17  }
 0x56e   : > { %s2713_s29 = scalar_lea.sflag [#allocation3], %s2712_s15 }
 0x56f   : > { %p3227_p2 = pnand %p3230_p1, %p3528_p6 }
 0x571   : > { %3402 = dma.done.wait (!%p3227_p2), %s2713_s29, 256  }
 0x572   : > { %3404 = vsyncadd (!%p3227_p2), %s2713_s29, 4294967040  ;;  %p21_p3 = scmp.ge.s32.totalorder %s3511_s23, 4   ;;  %s4466_s17 = smov %s3411_s18 }
 0x573   : > { %s4467_s18 = smov %s3415_s19  ;;  %s4468_s19 = smov %s3522_s26 }
 0x574   : > { %s4469_s20 = smov %s3511_s23  ;;  %23 = sbr.rel (!%p21_p3) target bundleno = 3 (0x3), region = 126 }
 0x57b   :  { %2718 = vsyncpa [#allocation3], 1 }
 0x57c   :  { %2720 = vsyncpa [#allocation3 + $0x1], 1 }

</bundles_post_ra>
